<compile_context>
chip_gen: v5e
topology: v5e:2x2
jax: 0.10.0
libtpu: 0.0.40
codegen_flags: <defaults>
</compile_context>

<pallas_src>
import functools
import math

import jax
import jax.numpy as jnp
from jax.experimental import pallas as pl
from jax.experimental.pallas import tpu as pltpu


def _round_up(x, m):
    return (x + m - 1) // m * m


# ---------------------------------------------------------------------------
# Fused kernel: 1x1 expand -> 3x3 depthwise -> 1x1 project (+ residual)
# ---------------------------------------------------------------------------

def _fused_inverted_residual_kernel(
        x_ref, mask_ref, w_pw_ref, b_pw_ref, w_dw_ref, b_dw_ref,
        w_pwl_ref, b_pwl_ref, *rest, Wp, TH, stride, has_residual):
    """Per grid step (n, rb):
      x_ref    : (1, Hp*Wp, Cin)  whole padded image, spatially flattened with an
                 8-aligned row stride Wp (columns parity-grouped if stride==2)
      mask_ref : (Hp*Wp, 1)       1.0 at real pixels, 0.0 on the 3x3 halo / padding
      w_pw     : (Cin, hidden)  bf16   b_pw  : (1, hidden) f32   (BN scale folded in w)
      w_dw     : (3, 3, hidden) f32    b_dw  : (1, hidden) f32
      w_pwl    : (hidden, oup)  bf16   b_pwl : (1, oup)    f32
      res_ref  : (1, TH*W, Cin)  [only if has_residual]  residual slab for this block
      o_ref    : (1, TH, Wo, oup)
      hid_ref  : (Hin, Wp, hidden) f32 VMEM scratch -- expanded activation for this
                 row block (never written to HBM).
    """
    if has_residual:
        res_ref, o_ref, hid_ref = rest
    else:
        o_ref, hid_ref = rest
        res_ref = None

    s = stride
    Hin = (TH - 1) * s + 3                 # hidden rows needed for TH output rows
    Wo = o_ref.shape[2]
    oup = o_ref.shape[3]
    hidden = hid_ref.shape[-1]
    m2 = Hin * Wp

    rb = pl.program_id(1)
    row_start = rb * (TH * s)              # first padded input row of this block
    flat_start = pl.multiple_of(row_start * Wp, 8)   # Wp % 8 == 0 -> aligned

    # ---- conv_pw: 1x1 expand + bias + ReLU -- ONE (m2, Cin)x(Cin, hidden) matmul ----
    x2d = x_ref[0, pl.ds(flat_start, m2), :].astype(jnp.bfloat16)
    hid = jnp.dot(x2d, w_pw_ref[...], preferred_element_type=jnp.float32)
    hid = jnp.maximum(hid + b_pw_ref[...], 0.0)
    hid = hid * mask_ref[pl.ds(flat_start, m2), :]           # zero the 3x3 halo
    hid3 = hid.reshape(Hin, Wp, hidden)                      # Wp % 8 == 0: layout no-op

    half_rows = TH + 1
    if s == 1:
        hid_ref[...] = hid3                                  # single bulk store
    else:
        # Parity scatter so every stride-2 depthwise tap below is a contiguous slice.
        for r in range(Hin):
            dst = (r % 2) * half_rows + r // 2
            hid_ref[dst] = hid3[r]

    # ---- conv_dw: 3x3 depthwise + bias + ReLU (strided output computed directly) ----
    half_cols = Wp // 2
    acc = jnp.zeros((TH, Wo, hidden), jnp.float32)
    for kh in range(3):
        r0 = kh if s == 1 else (kh % 2) * half_rows + kh // 2
        for kw in range(3):
            c0 = kw if s == 1 else (kw % 2) * half_cols + kw // 2
            patch = hid_ref[pl.ds(r0, TH), pl.ds(c0, Wo), :]   # (TH, Wo, hidden)
            acc = acc + patch * w_dw_ref[kh, kw, :]
    acc = jnp.maximum(acc + b_dw_ref[...], 0.0)

    # ---- conv_pwl: ONE (TH*Wo, hidden)x(hidden, oup) matmul + bias [+ residual] ----
    acc2 = acc.reshape(TH * Wo, hidden).astype(jnp.bfloat16)
    out = jnp.dot(acc2, w_pwl_ref[...], preferred_element_type=jnp.float32)
    out = out + b_pwl_ref[...]
    if has_residual:               # stride == 1 here, so Wo == W and oup == inp
        out = out + res_ref[0].astype(jnp.float32)
    o_ref[0] = out.reshape(TH, Wo, oup).astype(o_ref.dtype)   # single block-wide store


# ---------------------------------------------------------------------------
# Wrapper
# ---------------------------------------------------------------------------

def inverted_residual_forward(x_nchw, params, *, inp, oup, stride, row_tile=16):
    """NCHW in / NCHW out, matching the PyTorch module's interface."""
    assert stride in (1, 2)
    N, C, H, W = x_nchw.shape
    assert C == inp
    hidden = params["hidden"]
    has_residual = (inp == oup) and (stride == 1)

    Ho = (H - 1) // stride + 1
    Wo = (W - 1) // stride + 1
    Wp = _round_up(W + 2, 8)               # 8-aligned padded row stride

    # Row-block size: as large as the f32 hidden scratch comfortably allows.
    TH = max(1, min(row_tile, Ho))
    while TH > 1 and ((TH - 1) * stride + 3) * Wp * hidden * 4 > 20 * 2**20:
        TH = (TH + 1) // 2
    RB = pl.cdiv(Ho, TH)
    Ho_pad = RB * TH                       # cdiv grid: pad output rows, slice after
    Hin = (TH - 1) * stride + 3
    Hp = (Ho_pad - 1) * stride + 3         # padded input rows actually needed

    # NCHW -> NHWC once at the block boundary (a stacked network would do this once,
    # outside all blocks). Only the *small* input tensor is padded; the big hidden
    # activation is never padded / materialized in HBM.
    x = jnp.transpose(x_nchw, (0, 2, 3, 1))
    x_pad = jnp.pad(x, ((0, 0), (1, Hp - H - 1), (1, Wp - W - 1), (0, 0)))

    rows = jnp.arange(Hp)[:, None]
    cols = jnp.arange(Wp)[None, :]
    interior = (rows >= 1) & (rows <= H) & (cols >= 1) & (cols <= W)
    mask = interior.astype(jnp.float32)

    if stride == 2:
        # Group padded columns by parity so every stride-2 depthwise tap in the kernel
        # becomes a contiguous slice (cheap gather on the small input tensor only).
        col_perm = jnp.concatenate([jnp.arange(0, Wp, 2), jnp.arange(1, Wp, 2)])
        x_pad = x_pad[:, :, col_perm, :]
        mask = mask[:, col_perm]

    x_flat = x_pad.reshape(N, Hp * Wp, inp)
    mask_flat = mask.reshape(Hp * Wp, 1)

    inputs = [x_flat, mask_flat, params["w_pw"], params["b_pw"],
              params["w_dw"], params["b_dw"], params["w_pwl"], params["b_pwl"]]
    in_specs = [
        pl.BlockSpec((1, Hp * Wp, inp), lambda n, rb: (n, 0, 0)),   # padded input
        pl.BlockSpec((Hp * Wp, 1), lambda n, rb: (0, 0)),           # interior mask
        pl.BlockSpec((inp, hidden), lambda n, rb: (0, 0)),          # w_pw  (bf16, BN folded)
        pl.BlockSpec((1, hidden), lambda n, rb: (0, 0)),            # b_pw
        pl.BlockSpec((3, 3, hidden), lambda n, rb: (0, 0, 0)),      # w_dw  (BN folded)
        pl.BlockSpec((1, hidden), lambda n, rb: (0, 0)),            # b_dw
        pl.BlockSpec((hidden, oup), lambda n, rb: (0, 0)),          # w_pwl (bf16, BN folded)
        pl.BlockSpec((1, oup), lambda n, rb: (0, 0)),               # b_pwl
    ]
    if has_residual:
        # Aligned, auto-pipelined residual slab (one per row block); avoids per-row
        # unaligned slices of the padded input inside the kernel.
        res = x
        if Ho_pad > H:
            res = jnp.pad(res, ((0, 0), (0, Ho_pad - H), (0, 0), (0, 0)))
        res_flat = res.reshape(N, Ho_pad * W, inp)
        inputs.append(res_flat)
        in_specs.append(pl.BlockSpec((1, TH * W, inp), lambda n, rb: (n, rb, 0)))

    # VMEM budget: only raise the scoped limit when the footprint actually needs it.
    itemsize = jnp.dtype(x.dtype).itemsize
    est = (2 * Hp * Wp * (inp * itemsize + 4)          # input + mask blocks (2x buffered)
           + 2 * TH * Wo * oup * itemsize              # output block
           + Hin * Wp * hidden * 4                     # f32 hidden scratch
           + 2 * (inp * hidden + hidden * oup) * 2     # bf16 pointwise weights
           + 2 * 11 * hidden * 4 + 2 * oup * 4)        # dw weights + biases
    if has_residual:
        est += 2 * TH * W * inp * itemsize
    compiler_kwargs = dict(dimension_semantics=("parallel", "parallel"))
    if est > 12 * 2**20:
        # Defaults are 16 MiB (v5e) / 32 MiB (v6e, v7x); stay under v7x's 64 MiB physical.
        compiler_kwargs["vmem_limit_bytes"] = min(_round_up(int(1.5 * est), 2**20),
                                                  64 * 2**20)
    # TODO(synk): for very large spatial layers (e.g. 112x112 entry blocks) switch the
    # input to memory_space=pl.ANY with a manual double-buffered DMA of only the Hin-row
    # window per step, so resident input VMEM stays bounded on v7x.

    kernel = functools.partial(
        _fused_inverted_residual_kernel,
        Wp=Wp, TH=TH, stride=stride, has_residual=has_residual)

    out_nhwc = pl.pallas_call(
        kernel,
        out_shape=jax.ShapeDtypeStruct((N, Ho_pad, Wo, oup), x.dtype),
        grid=(N, RB),
        in_specs=in_specs,
        out_specs=pl.BlockSpec((1, TH, Wo, oup), lambda n, rb: (n, rb, 0, 0)),
        scratch_shapes=[pltpu.VMEM((Hin, Wp, hidden), jnp.float32)],
        compiler_params=pltpu.CompilerParams(**compiler_kwargs),
    )(*inputs)

    if Ho_pad > Ho:
        out_nhwc = out_nhwc[:, :Ho]
    return jnp.transpose(out_nhwc, (0, 3, 1, 2))


# ---------------------------------------------------------------------------
# Deterministic parameters with BN folded into the weights
# ---------------------------------------------------------------------------

def _bn_fold(key, c, eps=1e-5):
    kg, kb, km, kv = jax.random.split(key, 4)
    gamma = 1.0 + 0.1 * jax.random.normal(kg, (c,), jnp.float32)
    beta = 0.1 * jax.random.normal(kb, (c,), jnp.float32)
    mean = 0.05 * jax.random.normal(km, (c,), jnp.float32)
    var = jnp.abs(0.5 + 0.1 * jax.random.normal(kv, (c,), jnp.float32))
    scale = gamma / jnp.sqrt(var + eps)
    bias = beta - mean * scale
    return scale, bias


def make_inverted_residual_params(key, inp, oup, expand_ratio):
    hidden = int(round(inp * expand_ratio))
    k = jax.random.split(key, 6)
    w_pw = jax.random.normal(k[0], (inp, hidden), jnp.float32) / math.sqrt(inp)
    s_pw, b_pw = _bn_fold(k[1], hidden)
    w_dw = jax.random.normal(k[2], (3, 3, hidden), jnp.float32) / 3.0
    s_dw, b_dw = _bn_fold(k[3], hidden)
    w_pwl = jax.random.normal(k[4], (hidden, oup), jnp.float32) / math.sqrt(hidden)
    s_pwl, b_pwl = _bn_fold(k[5], oup)
    return dict(
        # BN scales folded into conv weights -> kernel only adds a bias.
        # Pointwise weights stored bf16 (MXU-native); depthwise stays f32 (v5e VPU has
        # no bf16).
        w_pw=(w_pw * s_pw[None, :]).astype(jnp.bfloat16),
        b_pw=b_pw.reshape(1, hidden),
        w_dw=w_dw * s_dw[None, None, :],
        b_dw=b_dw.reshape(1, hidden),
        w_pwl=(w_pwl * s_pwl[None, :]).astype(jnp.bfloat16),
        b_pwl=b_pwl.reshape(1, oup),
        hidden=hidden,
    )


# ---------------------------------------------------------------------------
# Pure-JAX reference (models the same bf16-operand / f32-accumulate matmuls)
# ---------------------------------------------------------------------------

def _reference(x_nchw, params, *, inp, oup, stride):
    x = jnp.transpose(x_nchw, (0, 2, 3, 1)).astype(jnp.float32)
    res = x
    xb = x.astype(jnp.bfloat16).astype(jnp.float32)
    y = jnp.einsum("nhwc,cd->nhwd", xb, params["w_pw"].astype(jnp.float32),
                   precision=jax.lax.Precision.HIGHEST) + params["b_pw"]
    y = jnp.maximum(y, 0.0)
    N, H, W, hidden = y.shape
    Ho = (H - 1) // stride + 1
    Wo = (W - 1) // stride + 1
    yp = jnp.pad(y, ((0, 0), (1, 1), (1, 1), (0, 0)))
    acc = jnp.zeros((N, Ho, Wo, hidden), jnp.float32)
    for kh in range(3):
        for kw in range(3):
            acc = acc + (yp[:, kh:kh + (Ho - 1) * stride + 1:stride,
                            kw:kw + (Wo - 1) * stride + 1:stride, :]
                         * params["w_dw"][kh, kw])
    acc = jnp.maximum(acc + params["b_dw"], 0.0)
    accb = acc.astype(jnp.bfloat16).astype(jnp.float32)
    z = jnp.einsum("nhwc,cd->nhwd", accb, params["w_pwl"].astype(jnp.float32),
                   precision=jax.lax.Precision.HIGHEST) + params["b_pwl"]
    if inp == oup and stride == 1:
        z = z + res
    return jnp.transpose(z, (0, 3, 1, 2))


# ---------------------------------------------------------------------------
# Main
# ---------------------------------------------------------------------------

if __name__ == "__main__":
    key = jax.random.PRNGKey(0)
    kx1, kp1, kx2, kp2 = jax.random.split(key, 4)

    # Case 1: inp == oup, stride 1 -> fused residual path.
    N, INP, OUP, H, W = 2, 8, 8, 16, 16
    x1 = jax.random.normal(kx1, (N, INP, H, W), jnp.float32)
    p1 = make_inverted_residual_params(kp1, INP, OUP, 4)
    out1 = jax.block_until_ready(
        inverted_residual_forward(x1, p1, inp=INP, oup=OUP, stride=1))
    ref1 = _reference(x1, p1, inp=INP, oup=OUP, stride=1)
    assert out1.shape == (N, OUP, H, W), out1.shape
    assert jnp.allclose(out1, ref1, atol=1e-2, rtol=1e-2), float(
        jnp.max(jnp.abs(out1 - ref1)))

    # Case 2: stride 2 with channel change -> no residual, strided dw done in-kernel.
    N2, INP2, OUP2, H2, W2 = 2, 8, 16, 16, 16
    x2 = jax.random.normal(kx2, (N2, INP2, H2, W2), jnp.float32)
    p2 = make_inverted_residual_params(kp2, INP2, OUP2, 4)
    out2 = jax.block_until_ready(
        inverted_residual_forward(x2, p2, inp=INP2, oup=OUP2, stride=2))
    ref2 = _reference(x2, p2, inp=INP2, oup=OUP2, stride=2)
    assert out2.shape == (N2, OUP2, H2 // 2, W2 // 2), out2.shape
    assert jnp.allclose(out2, ref2, atol=1e-2, rtol=1e-2), float(
        jnp.max(jnp.abs(out2 - ref2)))

    # TODO(synk): QAT fake-quant observers (QuantStub/DeQuantStub) are not modeled;
    # this is the float inference path (skip_add == plain add).
    print("KERNEL_OK")
</pallas_src>

<mosaic_0001>
module attributes {stable_mosaic.version = 11 : i64} {
  func.func @_fused_inverted_residual_kernel(%arg0: i32, %arg1: i32, %arg2: memref<1x432x8xf32, #tpu.memory_space<vmem>>, %arg3: memref<432x1xf32, #tpu.memory_space<vmem>>, %arg4: memref<8x32xbf16, #tpu.memory_space<vmem>>, %arg5: memref<1x32xf32, #tpu.memory_space<vmem>>, %arg6: memref<3x3x32xf32, #tpu.memory_space<vmem>>, %arg7: memref<1x32xf32, #tpu.memory_space<vmem>>, %arg8: memref<32x8xbf16, #tpu.memory_space<vmem>>, %arg9: memref<1x8xf32, #tpu.memory_space<vmem>>, %arg10: memref<1x256x8xf32, #tpu.memory_space<vmem>>, %arg11: memref<1x16x16x8xf32, #tpu.memory_space<vmem>>, %arg12: memref<18x24x32xf32, #tpu.memory_space<vmem>>) attributes {dimension_semantics = [#tpu.dimension_semantics<parallel>, #tpu.dimension_semantics<parallel>], iteration_bounds = array<i64: 2, 1>, scalar_prefetch = 0 : i64, scratch_operands = 1 : i64, tpu.core_type = #tpu.core_type<tc>, window_params = [{transform_indices = @transform_0, window_bounds = array<i64: 1, 432, 8>}, {pipeline_mode = #tpu.pipeline_mode<synchronous>, transform_indices = @transform_1, window_bounds = array<i64: 432, 1>}, {pipeline_mode = #tpu.pipeline_mode<synchronous>, transform_indices = @transform_2, window_bounds = array<i64: 8, 32>}, {pipeline_mode = #tpu.pipeline_mode<synchronous>, transform_indices = @transform_3, window_bounds = array<i64: 1, 32>}, {pipeline_mode = #tpu.pipeline_mode<synchronous>, transform_indices = @transform_4, window_bounds = array<i64: 3, 3, 32>}, {pipeline_mode = #tpu.pipeline_mode<synchronous>, transform_indices = @transform_5, window_bounds = array<i64: 1, 32>}, {pipeline_mode = #tpu.pipeline_mode<synchronous>, transform_indices = @transform_6, window_bounds = array<i64: 32, 8>}, {pipeline_mode = #tpu.pipeline_mode<synchronous>, transform_indices = @transform_7, window_bounds = array<i64: 1, 8>}, {transform_indices = @transform_8, window_bounds = array<i64: 1, 256, 8>}, {transform_indices = @transform_9, window_bounds = array<i64: 1, 16, 16, 8>}]} {
    %c16_i32 = arith.constant 16 : i32
    %0 = arith.muli %arg1, %c16_i32 : i32
    %c24_i32 = arith.constant 24 : i32
    %1 = arith.muli %0, %c24_i32 : i32
    %2 = tpu.assume_multiple %1, 8 : i32
    %c0 = arith.constant 0 : index
    %3 = arith.index_cast %2 : i32 to index
    %c0_0 = arith.constant 0 : index
    %4 = vector.load %arg2[%c0, %3, %c0_0] : memref<1x432x8xf32, #tpu.memory_space<vmem>>, vector<1x432x8xf32>
    %5 = vector.shape_cast %4 : vector<1x432x8xf32> to vector<432x8xf32>
    %6 = arith.truncf %5 : vector<432x8xf32> to vector<432x8xbf16>
    %c0_1 = arith.constant 0 : index
    %c0_2 = arith.constant 0 : index
    %7 = vector.load %arg4[%c0_1, %c0_2] : memref<8x32xbf16, #tpu.memory_space<vmem>>, vector<8x32xbf16>
    %cst = arith.constant dense<0.000000e+00> : vector<432x32xf32>
    %8 = tpu.matmul %6, %7, %cst {dimension_numbers = #tpu.dot_dimension_numbers<[1], [0], [0], [1], [0, 0, 1, 1], [], []>} : vector<432x8xbf16>, vector<8x32xbf16>, vector<432x32xf32> -> vector<432x32xf32>
    %c0_3 = arith.constant 0 : index
    %c0_4 = arith.constant 0 : index
    %9 = vector.load %arg5[%c0_3, %c0_4] : memref<1x32xf32, #tpu.memory_space<vmem>>, vector<1x32xf32>
    %10 = vector.broadcast %9 : vector<1x32xf32> to vector<432x32xf32>
    %11 = arith.addf %8, %10 : vector<432x32xf32>
    %cst_5 = arith.constant 0.000000e+00 : f32
    %12 = vector.broadcast %cst_5 : f32 to vector<432x32xf32>
    %13 = arith.maximumf %11, %12 : vector<432x32xf32>
    %14 = arith.index_cast %2 : i32 to index
    %c0_6 = arith.constant 0 : index
    %15 = vector.load %arg3[%14, %c0_6] : memref<432x1xf32, #tpu.memory_space<vmem>>, vector<432x1xf32>
    %16 = vector.broadcast %15 : vector<432x1xf32> to vector<432x32xf32>
    %17 = arith.mulf %13, %16 : vector<432x32xf32>
    %18 = vector.shape_cast %17 : vector<432x32xf32> to vector<18x24x32xf32>
    %c0_7 = arith.constant 0 : index
    %c0_8 = arith.constant 0 : index
    %c0_9 = arith.constant 0 : index
    %19 = vector.load %arg12[%c0_7, %c0_8, %c0_9] : memref<18x24x32xf32, #tpu.memory_space<vmem>>, vector<18x24x32xf32>
    tpu.vector_store %arg12[%c0_7, %c0_8, %c0_9], %18 {strides = array<i32>} : memref<18x24x32xf32, #tpu.memory_space<vmem>>, vector<18x24x32xf32>,
    %cst_10 = arith.constant 0.000000e+00 : f32
    %20 = vector.broadcast %cst_10 : f32 to vector<16x16x32xf32>
    %c0_11 = arith.constant 0 : index
    %c0_12 = arith.constant 0 : index
    %c0_13 = arith.constant 0 : index
    %21 = vector.load %arg12[%c0_11, %c0_12, %c0_13] : memref<18x24x32xf32, #tpu.memory_space<vmem>>, vector<16x16x32xf32>
    %c0_14 = arith.constant 0 : index
    %c0_15 = arith.constant 0 : index
    %c0_16 = arith.constant 0 : index
    %22 = vector.load %arg6[%c0_14, %c0_15, %c0_16] : memref<3x3x32xf32, #tpu.memory_space<vmem>>, vector<1x1x32xf32>
    %23 = vector.shape_cast %22 : vector<1x1x32xf32> to vector<32xf32>
    %24 = vector.shape_cast %23 : vector<32xf32> to vector<1x1x32xf32>
    %25 = vector.broadcast %24 : vector<1x1x32xf32> to vector<16x16x32xf32>
    %26 = arith.mulf %21, %25 : vector<16x16x32xf32>
    %27 = arith.addf %20, %26 : vector<16x16x32xf32>
    %c0_17 = arith.constant 0 : index
    %c1 = arith.constant 1 : index
    %c0_18 = arith.constant 0 : index
    %28 = vector.load %arg12[%c0_17, %c1, %c0_18] : memref<18x24x32xf32, #tpu.memory_space<vmem>>, vector<16x16x32xf32>
    %c0_19 = arith.constant 0 : index
    %c1_20 = arith.constant 1 : index
    %c0_21 = arith.constant 0 : index
    %29 = vector.load %arg6[%c0_19, %c1_20, %c0_21] : memref<3x3x32xf32, #tpu.memory_space<vmem>>, vector<1x1x32xf32>
    %30 = vector.shape_cast %29 : vector<1x1x32xf32> to vector<32xf32>
    %31 = vector.shape_cast %30 : vector<32xf32> to vector<1x1x32xf32>
    %32 = vector.broadcast %31 : vector<1x1x32xf32> to vector<16x16x32xf32>
    %33 = arith.mulf %28, %32 : vector<16x16x32xf32>
    %34 = arith.addf %27, %33 : vector<16x16x32xf32>
    %c0_22 = arith.constant 0 : index
    %c2 = arith.constant 2 : index
    %c0_23 = arith.constant 0 : index
    %35 = vector.load %arg12[%c0_22, %c2, %c0_23] : memref<18x24x32xf32, #tpu.memory_space<vmem>>, vector<16x16x32xf32>
    %c0_24 = arith.constant 0 : index
    %c2_25 = arith.constant 2 : index
    %c0_26 = arith.constant 0 : index
    %36 = vector.load %arg6[%c0_24, %c2_25, %c0_26] : memref<3x3x32xf32, #tpu.memory_space<vmem>>, vector<1x1x32xf32>
    %37 = vector.shape_cast %36 : vector<1x1x32xf32> to vector<32xf32>
    %38 = vector.shape_cast %37 : vector<32xf32> to vector<1x1x32xf32>
    %39 = vector.broadcast %38 : vector<1x1x32xf32> to vector<16x16x32xf32>
    %40 = arith.mulf %35, %39 : vector<16x16x32xf32>
    %41 = arith.addf %34, %40 : vector<16x16x32xf32>
    %c1_27 = arith.constant 1 : index
    %c0_28 = arith.constant 0 : index
    %c0_29 = arith.constant 0 : index
    %42 = vector.load %arg12[%c1_27, %c0_28, %c0_29] : memref<18x24x32xf32, #tpu.memory_space<vmem>>, vector<16x16x32xf32>
    %c1_30 = arith.constant 1 : index
    %c0_31 = arith.constant 0 : index
    %c0_32 = arith.constant 0 : index
    %43 = vector.load %arg6[%c1_30, %c0_31, %c0_32] : memref<3x3x32xf32, #tpu.memory_space<vmem>>, vector<1x1x32xf32>
    %44 = vector.shape_cast %43 : vector<1x1x32xf32> to vector<32xf32>
    %45 = vector.shape_cast %44 : vector<32xf32> to vector<1x1x32xf32>
    %46 = vector.broadcast %45 : vector<1x1x32xf32> to vector<16x16x32xf32>
    %47 = arith.mulf %42, %46 : vector<16x16x32xf32>
    %48 = arith.addf %41, %47 : vector<16x16x32xf32>
    %c1_33 = arith.constant 1 : index
    %c1_34 = arith.constant 1 : index
    %c0_35 = arith.constant 0 : index
    %49 = vector.load %arg12[%c1_33, %c1_34, %c0_35] : memref<18x24x32xf32, #tpu.memory_space<vmem>>, vector<16x16x32xf32>
    %c1_36 = arith.constant 1 : index
    %c1_37 = arith.constant 1 : index
    %c0_38 = arith.constant 0 : index
    %50 = vector.load %arg6[%c1_36, %c1_37, %c0_38] : memref<3x3x32xf32, #tpu.memory_space<vmem>>, vector<1x1x32xf32>
    %51 = vector.shape_cast %50 : vector<1x1x32xf32> to vector<32xf32>
    %52 = vector.shape_cast %51 : vector<32xf32> to vector<1x1x32xf32>
    %53 = vector.broadcast %52 : vector<1x1x32xf32> to vector<16x16x32xf32>
    %54 = arith.mulf %49, %53 : vector<16x16x32xf32>
    %55 = arith.addf %48, %54 : vector<16x16x32xf32>
    %c1_39 = arith.constant 1 : index
    %c2_40 = arith.constant 2 : index
    %c0_41 = arith.constant 0 : index
    %56 = vector.load %arg12[%c1_39, %c2_40, %c0_41] : memref<18x24x32xf32, #tpu.memory_space<vmem>>, vector<16x16x32xf32>
    %c1_42 = arith.constant 1 : index
    %c2_43 = arith.constant 2 : index
    %c0_44 = arith.constant 0 : index
    %57 = vector.load %arg6[%c1_42, %c2_43, %c0_44] : memref<3x3x32xf32, #tpu.memory_space<vmem>>, vector<1x1x32xf32>
    %58 = vector.shape_cast %57 : vector<1x1x32xf32> to vector<32xf32>
    %59 = vector.shape_cast %58 : vector<32xf32> to vector<1x1x32xf32>
    %60 = vector.broadcast %59 : vector<1x1x32xf32> to vector<16x16x32xf32>
    %61 = arith.mulf %56, %60 : vector<16x16x32xf32>
    %62 = arith.addf %55, %61 : vector<16x16x32xf32>
    %c2_45 = arith.constant 2 : index
    %c0_46 = arith.constant 0 : index
    %c0_47 = arith.constant 0 : index
    %63 = vector.load %arg12[%c2_45, %c0_46, %c0_47] : memref<18x24x32xf32, #tpu.memory_space<vmem>>, vector<16x16x32xf32>
    %c2_48 = arith.constant 2 : index
    %c0_49 = arith.constant 0 : index
    %c0_50 = arith.constant 0 : index
    %64 = vector.load %arg6[%c2_48, %c0_49, %c0_50] : memref<3x3x32xf32, #tpu.memory_space<vmem>>, vector<1x1x32xf32>
    %65 = vector.shape_cast %64 : vector<1x1x32xf32> to vector<32xf32>
    %66 = vector.shape_cast %65 : vector<32xf32> to vector<1x1x32xf32>
    %67 = vector.broadcast %66 : vector<1x1x32xf32> to vector<16x16x32xf32>
    %68 = arith.mulf %63, %67 : vector<16x16x32xf32>
    %69 = arith.addf %62, %68 : vector<16x16x32xf32>
    %c2_51 = arith.constant 2 : index
    %c1_52 = arith.constant 1 : index
    %c0_53 = arith.constant 0 : index
    %70 = vector.load %arg12[%c2_51, %c1_52, %c0_53] : memref<18x24x32xf32, #tpu.memory_space<vmem>>, vector<16x16x32xf32>
    %c2_54 = arith.constant 2 : index
    %c1_55 = arith.constant 1 : index
    %c0_56 = arith.constant 0 : index
    %71 = vector.load %arg6[%c2_54, %c1_55, %c0_56] : memref<3x3x32xf32, #tpu.memory_space<vmem>>, vector<1x1x32xf32>
    %72 = vector.shape_cast %71 : vector<1x1x32xf32> to vector<32xf32>
    %73 = vector.shape_cast %72 : vector<32xf32> to vector<1x1x32xf32>
    %74 = vector.broadcast %73 : vector<1x1x32xf32> to vector<16x16x32xf32>
    %75 = arith.mulf %70, %74 : vector<16x16x32xf32>
    %76 = arith.addf %69, %75 : vector<16x16x32xf32>
    %c2_57 = arith.constant 2 : index
    %c2_58 = arith.constant 2 : index
    %c0_59 = arith.constant 0 : index
    %77 = vector.load %arg12[%c2_57, %c2_58, %c0_59] : memref<18x24x32xf32, #tpu.memory_space<vmem>>, vector<16x16x32xf32>
    %c2_60 = arith.constant 2 : index
    %c2_61 = arith.constant 2 : index
    %c0_62 = arith.constant 0 : index
    %78 = vector.load %arg6[%c2_60, %c2_61, %c0_62] : memref<3x3x32xf32, #tpu.memory_space<vmem>>, vector<1x1x32xf32>
    %79 = vector.shape_cast %78 : vector<1x1x32xf32> to vector<32xf32>
    %80 = vector.shape_cast %79 : vector<32xf32> to vector<1x1x32xf32>
    %81 = vector.broadcast %80 : vector<1x1x32xf32> to vector<16x16x32xf32>
    %82 = arith.mulf %77, %81 : vector<16x16x32xf32>
    %83 = arith.addf %76, %82 : vector<16x16x32xf32>
    %c0_63 = arith.constant 0 : index
    %c0_64 = arith.constant 0 : index
    %84 = vector.load %arg7[%c0_63, %c0_64] : memref<1x32xf32, #tpu.memory_space<vmem>>, vector<1x32xf32>
    %85 = vector.shape_cast %84 : vector<1x32xf32> to vector<1x1x32xf32>
    %86 = vector.broadcast %85 : vector<1x1x32xf32> to vector<16x16x32xf32>
    %87 = arith.addf %83, %86 : vector<16x16x32xf32>
    %cst_65 = arith.constant 0.000000e+00 : f32
    %88 = vector.broadcast %cst_65 : f32 to vector<16x16x32xf32>
    %89 = arith.maximumf %87, %88 : vector<16x16x32xf32>
    %90 = vector.shape_cast %89 : vector<16x16x32xf32> to vector<256x32xf32>
    %91 = arith.truncf %90 : vector<256x32xf32> to vector<256x32xbf16>
    %c0_66 = arith.constant 0 : index
    %c0_67 = arith.constant 0 : index
    %92 = vector.load %arg8[%c0_66, %c0_67] : memref<32x8xbf16, #tpu.memory_space<vmem>>, vector<32x8xbf16>
    %cst_68 = arith.constant dense<0.000000e+00> : vector<256x8xf32>
    %93 = tpu.matmul %91, %92, %cst_68 {dimension_numbers = #tpu.dot_dimension_numbers<[1], [0], [0], [1], [0, 0, 1, 1], [], []>} : vector<256x32xbf16>, vector<32x8xbf16>, vector<256x8xf32> -> vector<256x8xf32>
    %c0_69 = arith.constant 0 : index
    %c0_70 = arith.constant 0 : index
    %94 = vector.load %arg9[%c0_69, %c0_70] : memref<1x8xf32, #tpu.memory_space<vmem>>, vector<1x8xf32>
    %95 = vector.broadcast %94 : vector<1x8xf32> to vector<256x8xf32>
    %96 = arith.addf %93, %95 : vector<256x8xf32>
    %c0_71 = arith.constant 0 : index
    %c0_72 = arith.constant 0 : index
    %c0_73 = arith.constant 0 : index
    %97 = vector.load %arg10[%c0_71, %c0_72, %c0_73] : memref<1x256x8xf32, #tpu.memory_space<vmem>>, vector<1x256x8xf32>
    %98 = vector.shape_cast %97 : vector<1x256x8xf32> to vector<256x8xf32>
    %99 = arith.addf %96, %98 : vector<256x8xf32>
    %100 = vector.shape_cast %99 : vector<256x8xf32> to vector<16x16x8xf32>
    %c0_74 = arith.constant 0 : index
    %c0_75 = arith.constant 0 : index
    %c0_76 = arith.constant 0 : index
    %c0_77 = arith.constant 0 : index
    %101 = vector.load %arg11[%c0_74, %c0_75, %c0_76, %c0_77] : memref<1x16x16x8xf32, #tpu.memory_space<vmem>>, vector<1x16x16x8xf32>
    %102 = vector.shape_cast %101 : vector<1x16x16x8xf32> to vector<16x16x8xf32>
    %103 = vector.shape_cast %100 : vector<16x16x8xf32> to vector<1x16x16x8xf32>
    tpu.vector_store %arg11[%c0_74, %c0_75, %c0_76, %c0_77], %103 {strides = array<i32>} : memref<1x16x16x8xf32, #tpu.memory_space<vmem>>, vector<1x16x16x8xf32>,
    return
  }
  func.func @transform_0(%arg0: i32, %arg1: i32) -> (i32, i32, i32) {
    %c0_i32 = arith.constant 0 : i32
    %c0_i32_0 = arith.constant 0 : i32
    %c0_i32_1 = arith.constant 0 : i32
    return %arg0, %c0_i32, %c0_i32_0 : i32, i32, i32
  }
  func.func @transform_1(%arg0: i32, %arg1: i32) -> (i32, i32) {
    %c0_i32 = arith.constant 0 : i32
    %c0_i32_0 = arith.constant 0 : i32
    %c0_i32_1 = arith.constant 0 : i32
    return %c0_i32, %c0_i32_0 : i32, i32
  }
  func.func @transform_2(%arg0: i32, %arg1: i32) -> (i32, i32) {
    %c0_i32 = arith.constant 0 : i32
    %c0_i32_0 = arith.constant 0 : i32
    %c0_i32_1 = arith.constant 0 : i32
    return %c0_i32, %c0_i32_0 : i32, i32
  }
  func.func @transform_3(%arg0: i32, %arg1: i32) -> (i32, i32) {
    %c0_i32 = arith.constant 0 : i32
    %c0_i32_0 = arith.constant 0 : i32
    %c0_i32_1 = arith.constant 0 : i32
    return %c0_i32, %c0_i32_0 : i32, i32
  }
  func.func @transform_4(%arg0: i32, %arg1: i32) -> (i32, i32, i32) {
    %c0_i32 = arith.constant 0 : i32
    %c0_i32_0 = arith.constant 0 : i32
    %c0_i32_1 = arith.constant 0 : i32
    %c0_i32_2 = arith.constant 0 : i32
    return %c0_i32, %c0_i32_0, %c0_i32_1 : i32, i32, i32
  }
  func.func @transform_5(%arg0: i32, %arg1: i32) -> (i32, i32) {
    %c0_i32 = arith.constant 0 : i32
    %c0_i32_0 = arith.constant 0 : i32
    %c0_i32_1 = arith.constant 0 : i32
    return %c0_i32, %c0_i32_0 : i32, i32
  }
  func.func @transform_6(%arg0: i32, %arg1: i32) -> (i32, i32) {
    %c0_i32 = arith.constant 0 : i32
    %c0_i32_0 = arith.constant 0 : i32
    %c0_i32_1 = arith.constant 0 : i32
    return %c0_i32, %c0_i32_0 : i32, i32
  }
  func.func @transform_7(%arg0: i32, %arg1: i32) -> (i32, i32) {
    %c0_i32 = arith.constant 0 : i32
    %c0_i32_0 = arith.constant 0 : i32
    %c0_i32_1 = arith.constant 0 : i32
    return %c0_i32, %c0_i32_0 : i32, i32
  }
  func.func @transform_8(%arg0: i32, %arg1: i32) -> (i32, i32, i32) {
    %c0_i32 = arith.constant 0 : i32
    %c0_i32_0 = arith.constant 0 : i32
    return %arg0, %arg1, %c0_i32 : i32, i32, i32
  }
  func.func @transform_9(%arg0: i32, %arg1: i32) -> (i32, i32, i32, i32) {
    %c0_i32 = arith.constant 0 : i32
    %c0_i32_0 = arith.constant 0 : i32
    %c0_i32_1 = arith.constant 0 : i32
    return %arg0, %arg1, %c0_i32, %c0_i32_0 : i32, i32, i32, i32
  }
}

</mosaic_0001>

<bundles_post_ra>
// kernel: tpu_custom_call.1
= control target key start
LH: loop header
LB: loop body
LE: loop exit
PB: predicated region body
PF: predicated region fallthrough
CT: control target
= control target key end

     0   :  { %s2743_s30 = smov 0   ;;  %s2745_s10 = smov 0   ;;  %s4305_s0 = inlined_call_operand.vmem [shape: f32[2,432,8], index: 0, kind: input, shape index: {}]   ;;  %s4306_s1 = inlined_call_operand.vmem [shape: f32[432,1], index: 1, kind: input, shape index: {}]   ;;  %s4307_s2 = inlined_call_operand.vmem [shape: bf16[8,32], index: 2, kind: input, shape index: {}]   ;;  %s4308_s3 = inlined_call_operand.vmem [shape: f32[1,32], index: 3, kind: input, shape index: {}]   ;;  %s4309_s4 = inlined_call_operand.vmem [shape: f32[3,3,32], index: 4, kind: input, shape index: {}]   ;;  %s4310_s5 = inlined_call_operand.vmem [shape: f32[1,32], index: 5, kind: input, shape index: {}]   ;;  %s4311_s6 = inlined_call_operand.vmem [shape: bf16[32,8], index: 6, kind: input, shape index: {}]   ;;  %s4312_s7 = inlined_call_operand.vmem [shape: f32[1,8], index: 7, kind: input, shape index: {}]   ;;  %s4313_s8 = inlined_call_operand.vmem [shape: f32[2,256,8], index: 8, kind: input, shape index: {}]   ;;  %s4314_s9 = inlined_call_operand.vmem [shape: f32[2,16,16,8], index: 9, kind: output, shape index: {}]  }
   0x1   :  { %s2747_s11 = smov 0  }
   0x2 LB: > { %s31_s12 = sadd.s32 1, %s2686_s10  ;;  %p2537_p0 = scmp.ge.s32.totalorder %s2690_s11, 1  ;;  %s2690_s11 = sphi %s2747_s11, %s19_s11   ;;  %s2686_s10 = sphi %s2745_s10, %s4425_s10   ;;  %s2682_s30 = sphi %s2743_s30, %s4424_s30  }
   0x3   : > { %p33_p1 = scmp.ge.s32.totalorder %s31_s12, 2  ;;  %p318_p2 = scmp.lt.s32.totalorder %s2690_s11, 3 }
   0x5   : > { %s4427_s12 = smov (%p33_p1, %s31_s12), 0  ;;  %p319_p3 = pnand %p2537_p0, %p318_p2 }
   0x7   : > { %322 = sbr.rel (%p319_p3) target bundleno = 579 (0x243), region = 56 }
   0xc   : > { %v772_v0 = vld [vmem:[%s4306_s1 + $0x20] sm:$0xff]  ;;  %v770_v1 = vld [vmem:[%s4306_s1 + $0x10] sm:$0xff]  ;;  %vm565_vm0 = vcmask 1043456   ;;  %p368_p4 = scmp.lt.s32.totalorder %s2682_s30, 1  ;;  %v2692_v3 = vmov 0   ;;  %v773_v6 = vld [vmem:[%s4306_s1 + $0x28] sm:$0xff] }
   0xd   : > { %v768_v2 = vld [vmem:[%s4306_s1] sm:$0xff]  ;;  %2638 = vset.pattern.permute.xlu2 %v2692_v3  ;;  %2637 = vset.pattern.permute.xlu1 %v2692_v3  ;;  %v771_v7 = vld [vmem:[%s4306_s1 + $0x18] sm:$0xff]  ;;  %v769_v8 = vld [vmem:[%s4306_s1 + $0x8] sm:$0xff]  ;;  %vm483_vm1 = vcmask 64512   ;;  %vm1146_vm2 = vcmask 261120  }
   0xe   : > { %v478_v4 = vld [vmem:[%s4307_s2] sm:$0xf]  ;;  %2636 = vset.pattern.permute.xlu0 %v2692_v3  ;;  %844 = vperm.xlu2 %2638, %v772_v0   ;;  %s4429_s30 = smov (!%p368_p4, %s2682_s30), 1  ;;  %v775_v19 = vld [vmem:[%s4306_s1 + $0x38] sm:$0xff]  ;;  %v774_v20 = vld [vmem:[%s4306_s1 + $0x30] sm:$0xff] }
   0xf   : > { %v567_v5 = vsel %vm565_vm0, %v478_v4, 0  ;;  %834 = vperm.xlu1 %2637, %v770_v1   ;;  %824 = vperm.xlu0 %2636, %v768_v2   ;;  %s2610_s21 = smul.u32 432, %s4429_s30  ;;  %v776_v18 = vld [vmem:[%s4306_s1 + $0x40] sm:$0xff]  ;;  %v779_v28 = vld [vmem:[%s4306_s1 + $0x58] sm:$0xff]  ;;  %v778_v29 = vld [vmem:[%s4306_s1 + $0x50] sm:$0xff]  ;;  %s2602_s27 = sshll.u32 %s4429_s30, 8 }
  0x10   : > { %576 = vmatpush.bf16.msra.mxu0 %v567_v5  ;;  %2606 = vmatpush.bf16.msra.mxu2 %v567_v5  ;;  %v777_v30 = vld [vmem:[%s4306_s1 + $0x48] sm:$0xff]  ;;  %v782_v33 = vld [vmem:[%s4306_s1 + $0x70] sm:$0xff]  ;;  %v780_v35 = vld [vmem:[%s4306_s1 + $0x60] sm:$0xff]  ;;  %s4032_s14 = scalar_lea.vmem %s4313_s8, %s2602_s27  ;;  %s4056_s18 = scalar_lea.vmem %s4314_s9, %s2602_s27 }
  0x11   : > { %2607 = vmatpush.bf16.msra.mxu3 %v567_v5  ;;  %s2788_s13 = scalar_lea.vmem %s4305_s0, %s2610_s21  ;;  %v781_v34 = vld [vmem:[%s4306_s1 + $0x68] sm:$0xff]  ;;  %v784_v44 = vld [vmem:[%s4306_s1 + $0x80] sm:$0xff]  ;;  %v783_v45 = vld [vmem:[%s4306_s1 + $0x78] sm:$0xff] }
  0x12   : > { %v397_v9 = vld [vmem:[%s2788_s13] sm:$0xff]  ;;  %v398_v10 = vld [vmem:[%s2788_s13 + $0x8] sm:$0xff]  ;;  %v419_v11 = vld [vmem:[%s2788_s13 + $0xb0] sm:$0xff] }
  0x13   : > { %v451_v12 = vpack.c.bf16 %v398_v10, %v397_v9  ;;  %v420_v13 = vld [vmem:[%s2788_s13 + $0xb8] sm:$0xff]  ;;  %v441_v14 = vld [vmem:[%s2788_s13 + $0x160] sm:$0xff]  ;;  %v442_v15 = vld [vmem:[%s2788_s13 + $0x168] sm:$0xff] }
  0x14   : > { %v462_v16 = vpack.c.bf16 %v420_v13, %v419_v11  ;;  %v473_v17 = vpack.c.bf16 %v442_v15, %v441_v14  ;;  %v399_v21 = vld [vmem:[%s2788_s13 + $0x10] sm:$0xff]  ;;  %v400_v22 = vld [vmem:[%s2788_s13 + $0x18] sm:$0xff]  ;;  %v421_v23 = vld [vmem:[%s2788_s13 + $0xc0] sm:$0xff] }
  0x15   : > { %2543 = vmatmul.msk.bf16.vlgmr.msra.gmra.mxu0 %vm483_vm1, %v451_v12  ;;  %v422_v24 = vld [vmem:[%s2788_s13 + $0xc8] sm:$0xff]  ;;  %v443_v25 = vld [vmem:[%s2788_s13 + $0x170] sm:$0xff]  ;;  %v444_v26 = vld [vmem:[%s2788_s13 + $0x178] sm:$0xff]  ;;  %v452_v27 = vpack.c.bf16 %v400_v22, %v399_v21 }
  0x16   : > { %849 = vperm.xlu2 %2638, %v773_v6   ;;  %2554 = vmatmul.msk.bf16.vlgmr.msra.gmra.mxu2 %vm483_vm1, %v462_v16  ;;  %v463_v31 = vpack.c.bf16 %v422_v24, %v421_v23  ;;  %v474_v32 = vpack.c.bf16 %v444_v26, %v443_v25  ;;  %v401_v36 = vld [vmem:[%s2788_s13 + $0x20] sm:$0xff]  ;;  %v402_v37 = vld [vmem:[%s2788_s13 + $0x28] sm:$0xff]  ;;  %v423_v38 = vld [vmem:[%s2788_s13 + $0xd0] sm:$0xff] }
  0x17   : > { %839 = vperm.xlu1 %2637, %v771_v7   ;;  %829 = vperm.xlu0 %2636, %v769_v8   ;;  %v424_v39 = vld [vmem:[%s2788_s13 + $0xd8] sm:$0xff]  ;;  %v445_v40 = vld [vmem:[%s2788_s13 + $0x180] sm:$0xff]  ;;  %v446_v41 = vld [vmem:[%s2788_s13 + $0x188] sm:$0xff]  ;;  %v453_v42 = vpack.c.bf16 %v402_v37, %v401_v36 }
  0x18   : > { %2565 = vmatmul.msk.bf16.vlgmr.msra.gmra.mxu3 %vm483_vm1, %v473_v17  ;;  %v785_v43 = vld [vmem:[%s4306_s1 + $0x88] sm:$0xff]  ;;  %v464_v46 = vpack.c.bf16 %v424_v39, %v423_v38  ;;  %v475_v47 = vpack.c.bf16 %v446_v41, %v445_v40  ;;  %v788_v48 = vld [vmem:[%s4306_s1 + $0xa0] sm:$0xff]  ;;  %v787_v49 = vld [vmem:[%s4306_s1 + $0x98] sm:$0xff] }
  0x19   : > { %v786_v50 = vld [vmem:[%s4306_s1 + $0x90] sm:$0xff]  ;;  %v404_v52 = vld [vmem:[%s2788_s13 + $0x38] sm:$0xff]  ;;  %v425_v53 = vld [vmem:[%s2788_s13 + $0xe0] sm:$0xff] }
  0x1a   : > { %v403_v51 = vld [vmem:[%s2788_s13 + $0x30] sm:$0xff]  ;;  %v426_v54 = vld [vmem:[%s2788_s13 + $0xe8] sm:$0xff]  ;;  %v448_v56 = vld [vmem:[%s2788_s13 + $0x198] sm:$0xff] }
  0x1b   : > { %v447_v55 = vld [vmem:[%s2788_s13 + $0x190] sm:$0xff]  ;;  %v454_v57 = vpack.c.bf16 %v404_v52, %v403_v51  ;;  %v801_v58 = vld [vmem:[%s4306_s1 + $0x108] sm:$0xff]  ;;  %v465_v61 = vpack.c.bf16 %v426_v54, %v425_v53  ;;  %v791_v63 = vld [vmem:[%s4306_s1 + $0xb8] sm:$0xff] }
  0x1c   : > { %v790_v59 = vld [vmem:[%s4306_s1 + $0xb0] sm:$0xff]  ;;  %v789_v60 = vld [vmem:[%s4306_s1 + $0xa8] sm:$0xff]  ;;  %v476_v62 = vpack.c.bf16 %v448_v56, %v447_v55  ;;  %v803_v0 = vld [vmem:[%s4306_s1 + $0x118] sm:$0xff] }
  0x1d   : > { %v802_v1 = vld [vmem:[%s4306_s1 + $0x110] sm:$0xff]  ;;  %v405_v2 = vld [vmem:[%s2788_s13 + $0x40] sm:$0xff]  ;;  %v406_v3 = vld [vmem:[%s2788_s13 + $0x48] sm:$0xff] }
  0x1e   : > { %864 = vperm.xlu2 %2638, %v776_v18   ;;  %v427_v4 = vld [vmem:[%s2788_s13 + $0xf0] sm:$0xff]  ;;  %v428_v5 = vld [vmem:[%s2788_s13 + $0xf8] sm:$0xff]  ;;  %v449_v6 = vld [vmem:[%s2788_s13 + $0x1a0] sm:$0xff]  ;;  %v455_v8 = vpack.c.bf16 %v406_v3, %v405_v2 }
  0x1f   : > { %859 = vperm.xlu1 %2637, %v775_v19   ;;  %854 = vperm.xlu0 %2636, %v774_v20   ;;  %v450_v7 = vld [vmem:[%s2788_s13 + $0x1a8] sm:$0xff]  ;;  %v806_v9 = vld [vmem:[%s4306_s1 + $0x130] sm:$0xff]  ;;  %v804_v11 = vld [vmem:[%s4306_s1 + $0x120] sm:$0xff]  ;;  %v466_v12 = vpack.c.bf16 %v428_v5, %v427_v4 }
  0x20   : > { %v805_v10 = vld [vmem:[%s4306_s1 + $0x128] sm:$0xff]  ;;  %v477_v13 = vpack.c.bf16 %v450_v7, %v449_v6  ;;  %v808_v15 = vld [vmem:[%s4306_s1 + $0x140] sm:$0xff]  ;;  %v807_v16 = vld [vmem:[%s4306_s1 + $0x138] sm:$0xff] }
  0x21   : > { %v809_v14 = vld [vmem:[%s4306_s1 + $0x148] sm:$0xff]  ;;  %v407_v17 = vld [vmem:[%s2788_s13 + $0x50] sm:$0xff]  ;;  %v408_v18 = vld [vmem:[%s2788_s13 + $0x58] sm:$0xff] }
  0x22   : > { %v429_v19 = vld [vmem:[%s2788_s13 + $0x100] sm:$0xff]  ;;  %v430_v20 = vld [vmem:[%s2788_s13 + $0x108] sm:$0xff]  ;;  %v456_v21 = vpack.c.bf16 %v408_v18, %v407_v17  ;;  %v794_v22 = vld [vmem:[%s4306_s1 + $0xd0] sm:$0xff] }
  0x23   : > { %v793_v23 = vld [vmem:[%s4306_s1 + $0xc8] sm:$0xff]  ;;  %v792_v24 = vld [vmem:[%s4306_s1 + $0xc0] sm:$0xff]  ;;  %v467_v25 = vpack.c.bf16 %v430_v20, %v429_v19  ;;  %v795_v38 = vld [vmem:[%s4306_s1 + $0xd8] sm:$0xff] }
  0x24   : > { %v797_v36 = vld [vmem:[%s4306_s1 + $0xe8] sm:$0xff]  ;;  %v796_v37 = vld [vmem:[%s4306_s1 + $0xe0] sm:$0xff]  ;;  %v815_v41 = vld [vmem:[%s4306_s1 + $0x178] sm:$0xff] }
  0x25   : > { %2544 = vmatmul.msk.bf16.gmra.mxu0 %vm483_vm1, %v452_v27  ;;  %v812_v27 = vld [vmem:[%s4306_s1 + $0x160] sm:$0xff]  ;;  %v799_v53 = vld [vmem:[%s4306_s1 + $0xf8] sm:$0xff]  ;;  %v798_v54 = vld [vmem:[%s4306_s1 + $0xf0] sm:$0xff] }
  0x26   : > { %879 = vperm.xlu2 %2638, %v779_v28   ;;  %2555 = vmatmul.msk.bf16.gmra.mxu2 %vm483_vm1, %v463_v31  ;;  %v811_v28 = vld [vmem:[%s4306_s1 + $0x158] sm:$0xff]  ;;  %v410_v31 = vld [vmem:[%s2788_s13 + $0x68] sm:$0xff]  ;;  %v800_v52 = vld [vmem:[%s4306_s1 + $0x100] sm:$0xff] }
  0x27   : > { %874 = vperm.xlu1 %2637, %v778_v29   ;;  %869 = vperm.xlu0 %2636, %v777_v30   ;;  %v810_v29 = vld [vmem:[%s4306_s1 + $0x150] sm:$0xff]  ;;  %v409_v30 = vld [vmem:[%s2788_s13 + $0x60] sm:$0xff]  ;;  %v436_v5 = vld [vmem:[%s2788_s13 + $0x138] sm:$0xff] }
  0x28   : > { %2566 = vmatmul.msk.bf16.gmra.mxu3 %vm483_vm1, %v474_v32  ;;  %v435_v4 = vld [vmem:[%s2788_s13 + $0x130] sm:$0xff] }
  0x2e   : > { %894 = vperm.xlu2 %2638, %v782_v33   ;;  %v431_v33 = vld [vmem:[%s2788_s13 + $0x110] sm:$0xff] }
  0x2f   : > { %889 = vperm.xlu1 %2637, %v781_v34   ;;  %884 = vperm.xlu0 %2636, %v780_v35   ;;  %v432_v34 = vld [vmem:[%s2788_s13 + $0x118] sm:$0xff]  ;;  %v457_v35 = vpack.c.bf16 %v410_v31, %v409_v30  ;;  %v437_v30 = vld [vmem:[%s2788_s13 + $0x140] sm:$0xff]  ;;  %v438_v31 = vld [vmem:[%s2788_s13 + $0x148] sm:$0xff] }
  0x30   : > { %v468_v39 = vpack.c.bf16 %v432_v34, %v431_v33 }
  0x35   : > { %2545 = vmatmul.msk.bf16.gmra.mxu0 %vm483_vm1, %v453_v42  ;;  %v814_v42 = vld [vmem:[%s4306_s1 + $0x170] sm:$0xff] }
  0x36   : > { %909 = vperm.xlu2 %2638, %v785_v43   ;;  %2556 = vmatmul.msk.bf16.gmra.mxu2 %vm483_vm1, %v464_v46  ;;  %v813_v43 = vld [vmem:[%s4306_s1 + $0x168] sm:$0xff] }
  0x37   : > { %904 = vperm.xlu1 %2637, %v784_v44   ;;  %899 = vperm.xlu0 %2636, %v783_v45   ;;  %v411_v44 = vld [vmem:[%s2788_s13 + $0x70] sm:$0xff]  ;;  %v412_v45 = vld [vmem:[%s2788_s13 + $0x78] sm:$0xff] }
  0x38   : > { %2567 = vmatmul.msk.bf16.gmra.mxu3 %vm483_vm1, %v475_v47  ;;  %v458_v51 = vpack.c.bf16 %v412_v45, %v411_v44 }
  0x3e   : > { %924 = vperm.xlu2 %2638, %v788_v48  }
  0x3f   : > { %919 = vperm.xlu1 %2637, %v787_v49   ;;  %914 = vperm.xlu0 %2636, %v786_v50   ;;  %v433_v49 = vld [vmem:[%s2788_s13 + $0x120] sm:$0xff]  ;;  %v434_v50 = vld [vmem:[%s2788_s13 + $0x128] sm:$0xff] }
  0x40   : > { %v469_v55 = vpack.c.bf16 %v434_v50, %v433_v49 }
  0x45   : > { %2546 = vmatmul.msk.bf16.gmra.mxu0 %vm483_vm1, %v454_v57 }
  0x46   : > { %989 = vperm.xlu2 %2638, %v801_v58   ;;  %2557 = vmatmul.msk.bf16.gmra.mxu2 %vm483_vm1, %v465_v61  ;;  %v816_v61 = vld [vmem:[%s4306_s1 + $0x180] sm:$0xff] }
  0x47   : > { %934 = vperm.xlu1 %2637, %v790_v59   ;;  %929 = vperm.xlu0 %2636, %v789_v60   ;;  %v818_v59 = vld [vmem:[%s4306_s1 + $0x190] sm:$0xff]  ;;  %v817_v60 = vld [vmem:[%s4306_s1 + $0x188] sm:$0xff] }
  0x48   : > { %2568 = vmatmul.msk.bf16.gmra.mxu3 %vm483_vm1, %v476_v62  ;;  %v413_v62 = vld [vmem:[%s2788_s13 + $0x80] sm:$0xff] }
  0x4e   : > { %939 = vperm.xlu2 %2638, %v791_v63   ;;  %v414_v63 = vld [vmem:[%s2788_s13 + $0x88] sm:$0xff] }
  0x4f   : > { %999 = vperm.xlu1 %2637, %v803_v0   ;;  %994 = vperm.xlu0 %2636, %v802_v1   ;;  %v3009_v1 = vld [vmem:[%s4308_s3] ss:$0 sm:$0xff]  ;;  %v459_v6 = vpack.c.bf16 %v414_v63, %v413_v62  ;;  %v439_v62 = vld [vmem:[%s2788_s13 + $0x150] sm:$0xff]  ;;  %v440_v63 = vld [vmem:[%s2788_s13 + $0x158] sm:$0xff] }
  0x55   : > { %2547 = vmatmul.msk.bf16.gmra.mxu0 %vm483_vm1, %v455_v8  ;;  %v821_v8 = vld [vmem:[%s4306_s1 + $0x1a8] sm:$0xff] }
  0x56   : > { %1014 = vperm.xlu2 %2638, %v806_v9   ;;  %2558 = vmatmul.msk.bf16.gmra.mxu2 %vm483_vm1, %v466_v12  ;;  %v470_v12 = vpack.c.bf16 %v436_v5, %v435_v4 }
  0x57   : > { %1009 = vperm.xlu1 %2637, %v805_v10   ;;  %1004 = vperm.xlu0 %2636, %v804_v11   ;;  %v820_v10 = vld [vmem:[%s4306_s1 + $0x1a0] sm:$0xff]  ;;  %v819_v11 = vld [vmem:[%s4306_s1 + $0x198] sm:$0xff] }
  0x58   : > { %2569 = vmatmul.msk.bf16.gmra.mxu3 %vm483_vm1, %v477_v13 }
  0x5e   : > { %1029 = vperm.xlu2 %2638, %v809_v14  }
  0x5f   : > { %1024 = vperm.xlu1 %2637, %v808_v15   ;;  %1019 = vperm.xlu0 %2636, %v807_v16  }
  0x65   : > { %2548 = vmatmul.msk.bf16.gmra.mxu0 %vm483_vm1, %v456_v21 }
  0x66   : > { %954 = vperm.xlu2 %2638, %v794_v22   ;;  %2559 = vmatmul.msk.bf16.gmra.mxu2 %vm483_vm1, %v467_v25 }
  0x67   : > { %949 = vperm.xlu1 %2637, %v793_v23   ;;  %944 = vperm.xlu0 %2636, %v792_v24   ;;  %v415_v23 = vld [vmem:[%s2788_s13 + $0x90] sm:$0xff]  ;;  %v416_v24 = vld [vmem:[%s2788_s13 + $0x98] sm:$0xff] }
  0x68   : > { %v2931_v26 = vpop.permute.xlu2 %844  ;;  %v460_v33 = vpack.c.bf16 %v416_v24, %v415_v23 }
  0x6e   : > { %1044 = vperm.xlu2 %2638, %v812_v27  }
  0x6f   : > { %1039 = vperm.xlu1 %2637, %v811_v28   ;;  %1034 = vperm.xlu0 %2636, %v810_v29  }
  0x70   : > { %v2944_v32 = vpop.permute.xlu2 %849 }
  0x75   : > { %2549 = vmatmul.msk.bf16.gmra.mxu0 %vm483_vm1, %v457_v35 }
  0x76   : > { %969 = vperm.xlu2 %2638, %v797_v36   ;;  %2560 = vmatmul.msk.bf16.gmra.mxu2 %vm483_vm1, %v468_v39 }
  0x77   : > { %964 = vperm.xlu1 %2637, %v796_v37   ;;  %959 = vperm.xlu0 %2636, %v795_v38   ;;  %v471_v38 = vpack.c.bf16 %v438_v31, %v437_v30 }
  0x78   : > { %v2959_v40 = vpop.permute.xlu2 %864 }
  0x7e   : > { %1059 = vperm.xlu2 %2638, %v815_v41  }
  0x7f   : > { %1054 = vperm.xlu1 %2637, %v814_v42   ;;  %1049 = vperm.xlu0 %2636, %v813_v43  }
  0x80   : > { %v2972_v46 = vpop.permute.xlu2 %879 }
  0x81   : > { %v2974_v47 = vpop.permute.xlu1 %834  ;;  %v825_v48 = vpop.permute.xlu0 %824 }
  0x85   : > { %2550 = vmatmul.msk.bf16.gmra.mxu0 %vm483_vm1, %v458_v51 }
  0x86   : > { %984 = vperm.xlu2 %2638, %v800_v52   ;;  %2561 = vmatmul.msk.bf16.gmra.mxu2 %vm483_vm1, %v469_v55  ;;  %v418_v55 = vld [vmem:[%s2788_s13 + $0xa8] sm:$0xff] }
  0x87   : > { %979 = vperm.xlu1 %2637, %v799_v53   ;;  %974 = vperm.xlu0 %2636, %v798_v54   ;;  %v417_v54 = vld [vmem:[%s2788_s13 + $0xa0] sm:$0xff] }
  0x88   : > { %v2989_v56 = vpop.permute.xlu2 %894  ;;  %v461_v5 = vpack.c.bf16 %v418_v55, %v417_v54 }
  0x89   : > { %v2991_v57 = vpop.permute.xlu1 %839  ;;  %v830_v58 = vpop.permute.xlu0 %829 }
  0x8e   : > { %1074 = vperm.xlu2 %2638, %v818_v59  }
  0x8f   : > { %1069 = vperm.xlu1 %2637, %v817_v60   ;;  %1064 = vperm.xlu0 %2636, %v816_v61  }
  0x90   : > { %v3004_v0 = vpop.permute.xlu2 %909 }
  0x91   : > { %4327 = vst [vmem:[#allocation3_spill] sm:$0xff] %v3004_v0  ;;  %v3011_v2 = vpop.permute.xlu1 %859  ;;  %v3013_v3 = vpop.permute.xlu0 %854 }
  0x92   : > { %v578_v7 = vpop.f32.mrf.mxu0 }
  0x93   : > { %v579_v9 = vadd.f32 %v3009_v1, %v578_v7 }
  0x95   : > { %v713_v13 = vmax.f32 %v579_v9, 0.0  ;;  %2551 = vmatmul.msk.bf16.gmra.mxu0 %vm483_vm1, %v459_v6  ;;  %v472_v9 = vpack.c.bf16 %v440_v63, %v439_v62  ;;  %v3129_v62 = vld [vmem:[%s4309_s4] ss:$0 sm:$0xff] }
  0x96   : > { %1089 = vperm.xlu2 %2638, %v821_v8   ;;  %2562 = vmatmul.msk.bf16.gmra.mxu2 %vm483_vm1, %v470_v12 }
  0x97   : > { %1084 = vperm.xlu1 %2637, %v820_v10   ;;  %1079 = vperm.xlu0 %2636, %v819_v11   ;;  %v1092_v14 = vmul.f32 %v825_v48, %v713_v13 }
  0x98   : > { %v3029_v15 = vpop.permute.xlu2 %924 }
  0x99   : > { %4328 = vst [vmem:[#allocation4_spill] sm:$0xff] %v3029_v15  ;;  %v3031_v16 = vpop.permute.xlu1 %874  ;;  %v3033_v17 = vpop.permute.xlu0 %869 }
  0x9a   : > { %1147 = vst.msk [vmem:[#allocation2] sm:$0xff] %vm1146_vm2, %v1092_v14  ;;  %v633_v18 = vpop.f32.mrf.mxu2  ;;  %v580_v19 = vpop.f32.mrf.mxu0 }
  0x9b   : > { %v581_v20 = vadd.f32 %v3009_v1, %v580_v19  ;;  %v3037_v21 = vpop.f32.mrf.mxu3  ;;  %v634_v4 = vadd.f32 %v3009_v1, %v633_v18 }
  0x9d   : > { %v714_v22 = vmax.f32 %v581_v20, 0.0  ;;  %v735_v10 = vmax.f32 %v634_v4, 0.0 }
  0x9f   : > { %v1093_v25 = vmul.f32 %v830_v58, %v714_v22 }
  0xa0   : > { %v3041_v27 = vpop.permute.xlu2 %989 }
  0xa1   : > { %v3043_v28 = vpop.permute.xlu1 %889  ;;  %v3045_v29 = vpop.permute.xlu0 %884  ;;  %1148 = vst.msk [vmem:[#allocation2 + $0x8] sm:$0xff] %vm1146_vm2, %v1093_v25 }
  0xa2   : > { %v635_v34 = vpop.f32.mrf.mxu2  ;;  %v583_v35 = vpop.f32.mrf.mxu0 }
  0xa3   : > { %v636_v36 = vadd.f32 %v3009_v1, %v635_v34  ;;  %v584_v37 = vadd.f32 %v3009_v1, %v583_v35  ;;  %v3052_v39 = vpop.f32.mrf.mxu3  ;;  %v689_v34 = vadd.f32 %v3009_v1, %v3037_v21  ;;  %v3116_v21 = vld [vmem:[%s4309_s4 + $0x1] ss:$0 sm:$0xff] }
  0xa5   : > { %v736_v41 = vmax.f32 %v636_v36, 0.0  ;;  %v715_v42 = vmax.f32 %v584_v37, 0.0  ;;  %2552 = vmatmul.msk.bf16.gmra.mxu0 %vm483_vm1, %v460_v33 }
  0xa6   : > { %2563 = vmatmul.msk.bf16.gmra.mxu2 %vm483_vm1, %v471_v38 }
  0xa7   : > { %v1094_v43 = vmul.f32 %v2974_v47, %v715_v42 }
  0xa8   : > { %v940_v44 = vpop.permute.xlu2 %939 }
  0xa9   : > { %v1115_v45 = vmul.f32 %v940_v44, %v736_v41  ;;  %v3057_v48 = vpop.permute.xlu1 %904  ;;  %v3059_v49 = vpop.permute.xlu0 %899  ;;  %1149 = vst.msk [vmem:[#allocation2 + $0x10] sm:$0xff] %vm1146_vm2, %v1094_v43 }
  0xaa   : > { %4329 = vst [vmem:[#allocation5_spill] sm:$0xff] %v3057_v48  ;;  %v3063_v50 = vpop.f32.mrf.mxu2  ;;  %v585_v51 = vpop.f32.mrf.mxu0 }
  0xab   : > { %1170 = vst.msk [vmem:[#allocation2 + $0xb8] sm:$0xff] %vm1146_vm2, %v1115_v45  ;;  %v586_v52 = vadd.f32 %v3009_v1, %v585_v51  ;;  %v3066_v47 = vpop.f32.mrf.mxu3 }
  0xad   : > { %v716_v53 = vmax.f32 %v586_v52, 0.0  ;;  %v2605_v52 = vld [vmem:[%s4311_s6 + $0x8] sm:$0xff] }
  0xae   : > { %2245 = vmatpush.bf16.msra.mxu1 %v2605_v52  ;;  %2608 = vmatpush.bf16.msrb.mxu3 %v2605_v52 }
  0xaf   : > { %v1095_v58 = vmul.f32 %v2991_v57, %v716_v53  ;;  %v1299_v53 = vld [vmem:[#allocation2 + $0x1] sm:$0xff] }
  0xb0   : > { %v3071_v59 = vpop.permute.xlu2 %1014 }
  0xb1   : > { %4330 = vst [vmem:[#allocation6_spill] sm:$0xff] %v3071_v59  ;;  %v3073_v60 = vpop.permute.xlu1 %919  ;;  %v3075_v61 = vpop.permute.xlu0 %914 }
  0xb2   : > { %4331 = vst [vmem:[#allocation7_spill] sm:$0xff] %v3073_v60  ;;  %v3081_v6 = vpop.f32.mrf.mxu2  ;;  %v588_v7 = vpop.f32.mrf.mxu0 }
  0xb3   : > { %4332 = vst [vmem:[#allocation8_spill] sm:$0xff] %v3075_v61  ;;  %v589_v8 = vadd.f32 %v3009_v1, %v588_v7  ;;  %v3084_v57 = vpop.f32.mrf.mxu3 }
  0xb4   : > { %1150 = vst.msk [vmem:[#allocation2 + $0x18] sm:$0xff] %vm1146_vm2, %v1095_v58 }
  0xb5   : > { %v717_v11 = vmax.f32 %v589_v8, 0.0  ;;  %2553 = vmatmul.msk.bf16.gmra.mxu0 %vm483_vm1, %v461_v5  ;;  %v1333_v5 = vmul.f32 %v3116_v21, %v1299_v53  ;;  %v1398_v53 = vld [vmem:[#allocation2 + $0xa] sm:$0xff] }
  0xb6   : > { %2564 = vmatmul.msk.bf16.gmra.mxu2 %vm483_vm1, %v472_v9  ;;  %v2604_v9 = vld [vmem:[%s4311_s6] sm:$0xff] }
  0xb7   : > { %v1096_v12 = vmul.f32 %v2931_v26, %v717_v11  ;;  %v1300_v11 = vld [vmem:[#allocation2 + $0x9] sm:$0xff]  ;;  %2246 = vmatpush.bf16.msra.mxu1 %v2604_v9  ;;  %2609 = vmatpush.bf16.msrb.mxu3 %v2604_v9 }
  0xb8   : > { %v3089_v13 = vpop.permute.xlu2 %1029 }
  0xb9   : > { %4333 = vst [vmem:[#allocation9_spill] sm:$0xff] %v3089_v13  ;;  %v935_v14 = vpop.permute.xlu1 %934  ;;  %v3091_v18 = vpop.permute.xlu0 %929 }
  0xba   : > { %4334 = vst [vmem:[#allocation10_spill] sm:$0xff] %v3091_v18  ;;  %v1114_v19 = vmul.f32 %v935_v14, %v735_v10  ;;  %v643_v20 = vpop.f32.mrf.mxu2  ;;  %v590_v22 = vpop.f32.mrf.mxu0  ;;  %v3151_v14 = vld [vmem:[%s4309_s4 + $0x4] ss:$0 sm:$0xff] }
  0xbb   : > { %1151 = vst.msk [vmem:[#allocation2 + $0x20] sm:$0xff] %vm1146_vm2, %v1096_v12  ;;  %v644_v23 = vadd.f32 %v3009_v1, %v643_v20  ;;  %v591_v24 = vadd.f32 %v3009_v1, %v590_v22  ;;  %v3097_v25 = vpop.f32.mrf.mxu3  ;;  %v3146_v12 = vld [vmem:[%s4309_s4 + $0x2] ss:$0 sm:$0xff]  ;;  %v3153_v22 = vld [vmem:[#allocation2 + $0x18] sm:$0xff] }
  0xbc   : > { %1169 = vst.msk [vmem:[#allocation2 + $0xb0] sm:$0xff] %vm1146_vm2, %v1114_v19  ;;  %v1397_v20 = vld [vmem:[#allocation2 + $0x2] sm:$0xff] }
  0xbd   : > { %v739_v26 = vmax.f32 %v644_v23, 0.0  ;;  %v718_v30 = vmax.f32 %v591_v24, 0.0  ;;  %v1202_v23 = vld [vmem:[#allocation2 + $0x8] sm:$0xff] }
  0xbf   : > { %v1097_v31 = vmul.f32 %v2944_v32, %v718_v30  ;;  %v757_v32 = vmax.f32 %v689_v34, 0.0 }
  0xc0   : > { %v955_v33 = vpop.permute.xlu2 %954 }
  0xc1   : > { %v1118_v35 = vmul.f32 %v955_v33, %v739_v26  ;;  %v3102_v36 = vpop.permute.xlu1 %999  ;;  %v3104_v37 = vpop.permute.xlu0 %994  ;;  %1152 = vst.msk [vmem:[#allocation2 + $0x28] sm:$0xff] %vm1146_vm2, %v1097_v31  ;;  %v3158_v26 = vld [vmem:[%s4309_s4 + $0x5] ss:$0 sm:$0xff]  ;;  %v1334_v33 = vmul.f32 %v3116_v21, %v1300_v11 }
  0xc2   : > { %v3108_v38 = vpop.f32.mrf.mxu2  ;;  %v593_v41 = vpop.f32.mrf.mxu0  ;;  %v3162_v34 = vld [vmem:[#allocation2 + $0x19] sm:$0xff] }
  0xc3   : > { %1173 = vst.msk [vmem:[#allocation2 + $0xd0] sm:$0xff] %vm1146_vm2, %v1118_v35  ;;  %v594_v42 = vadd.f32 %v3009_v1, %v593_v41  ;;  %v3111_v43 = vpop.f32.mrf.mxu3  ;;  %v696_v35 = vadd.f32 %v3009_v1, %v3084_v57 }
  0xc5   : > { %v719_v44 = vmax.f32 %v594_v42, 0.0 }
  0xc7   : > { %v1098_v45 = vmul.f32 %v3013_v3, %v719_v44  ;;  %v1201_v3 = vld [vmem:[#allocation2] sm:$0xff]  ;;  %v1531_v44 = vmul.f32 %v3151_v14, %v3153_v22 }
  0xc8   : > { %v1045_v51 = vpop.permute.xlu2 %1044  ;;  %v1235_v10 = vmul.f32 %v3129_v62, %v1201_v3  ;;  %v641_v3 = vadd.f32 %v3009_v1, %v3081_v6  ;;  %v1432_v6 = vmul.f32 %v3146_v12, %v1398_v53 }
  0xc9   : > { %v1136_v54 = vmul.f32 %v1045_v51, %v757_v32  ;;  %v3122_v55 = vpop.permute.xlu1 %1009  ;;  %v3124_v58 = vpop.permute.xlu0 %1004  ;;  %1153 = vst.msk [vmem:[#allocation2 + $0x30] sm:$0xff] %vm1146_vm2, %v1098_v45  ;;  %v1431_v32 = vmul.f32 %v3146_v12, %v1397_v20  ;;  %v639_v45 = vadd.f32 %v3009_v1, %v3063_v50  ;;  %v760_v50 = vmax.f32 %v696_v35, 0.0 }
  0xca   : > { %v3133_v63 = vpop.f32.mrf.mxu2  ;;  %v595_v4 = vpop.f32.mrf.mxu0  ;;  %v1365_v24 = vadd.f32 %v1333_v5, %v1235_v10  ;;  %v3185_v10 = vld [vmem:[#allocation2 + $0x20] sm:$0xff] }
  0xcb   : > { %1191 = vst.msk [vmem:[#allocation2 + $0x160] sm:$0xff] %vm1146_vm2, %v1136_v54  ;;  %v596_v7 = vadd.f32 %v3009_v1, %v595_v4  ;;  %v3137_v8 = vpop.f32.mrf.mxu3  ;;  %v1629_v54 = vmul.f32 %v3158_v26, %v3162_v34  ;;  %v1532_v35 = vmul.f32 %v3151_v14, %v3185_v10 }
  0xcc   : > { %v1463_v57 = vadd.f32 %v1431_v32, %v1365_v24  ;;  %v3193_v24 = vld [vmem:[#allocation2 + $0x21] sm:$0xff] }
  0xcd   : > { %v720_v19 = vmax.f32 %v596_v7, 0.0 }
  0xce   : > { %v1563_v11 = vadd.f32 %v1531_v44, %v1463_v57 }
  0xcf   : > { %v1099_v30 = vmul.f32 %v3011_v2, %v720_v19  ;;  %v1236_v2 = vmul.f32 %v3129_v62, %v1202_v23  ;;  %v3190_v19 = vld [vmem:[%s4309_s4 + $0x6] ss:$0 sm:$0xff] }
  0xd0   : > { %v970_v31 = vpop.permute.xlu2 %969  ;;  %v3197_v32 = vld [vmem:[#allocation2 + $0x30] sm:$0xff]  ;;  %v1661_v44 = vadd.f32 %v1629_v54, %v1563_v11 }
  0xd1   : > { %v3166_v41 = vpop.permute.xlu1 %1024  ;;  %v3168_v42 = vpop.permute.xlu0 %1019  ;;  %1154 = vst.msk [vmem:[#allocation2 + $0x38] sm:$0xff] %vm1146_vm2, %v1099_v30  ;;  %v1366_v9 = vadd.f32 %v1334_v33, %v1236_v2  ;;  %v3195_v30 = vld [vmem:[#allocation2 + $0x1a] sm:$0xff]  ;;  %v737_v33 = vmax.f32 %v639_v45, 0.0  ;;  %v3204_v2 = vld [vmem:[%s4309_s4 + $0x8] ss:$0 sm:$0xff]  ;;  %v1630_v45 = vmul.f32 %v3158_v26, %v3193_v24 }
  0xd2   : > { %4335 = vst [vmem:[#allocation11_spill] sm:$0xff] %v3166_v41  ;;  %v650_v51 = vpop.f32.mrf.mxu2  ;;  %v598_v52 = vpop.f32.mrf.mxu0  ;;  %v1727_v54 = vmul.f32 %v3190_v19, %v3195_v30  ;;  %v1827_v11 = vmul.f32 %v3204_v2, %v3197_v32  ;;  %v3230_v41 = vld [vmem:[#allocation2 + $0x22] sm:$0xff] }
  0xd3   : > { %4336 = vst [vmem:[#allocation12_spill] sm:$0xff] %v3168_v42  ;;  %v651_v4 = vadd.f32 %v3009_v1, %v650_v51  ;;  %v599_v5 = vadd.f32 %v3009_v1, %v598_v52  ;;  %v3183_v7 = vpop.f32.mrf.mxu3  ;;  %v738_v51 = vmax.f32 %v641_v3, 0.0 }
  0xd5   : > { %v742_v20 = vmax.f32 %v651_v4, 0.0  ;;  %v721_v23 = vmax.f32 %v599_v5, 0.0  ;;  %v1464_v4 = vadd.f32 %v1432_v6, %v1366_v9 }
  0xd7   : > { %v1121_v52 = vmul.f32 %v970_v31, %v742_v20  ;;  %v1100_v53 = vmul.f32 %v2959_v40, %v721_v23  ;;  %v3218_v40 = vld [vmem:[%s4309_s4 + $0x9] ss:$0 sm:$0xff]  ;;  %v1564_v20 = vadd.f32 %v1532_v35, %v1464_v4  ;;  %v1759_v23 = vadd.f32 %v1727_v54, %v1661_v44  ;;  %v3245_v4 = vld [vmem:[%s4309_s4 + $0xa] ss:$0 sm:$0xff] }
  0xd8   : > { %v1060_v57 = vpop.permute.xlu2 %1059  ;;  %v3213_v13 = vld [vmem:[#allocation2 + $0x31] sm:$0xff] }
  0xd9   : > { %v1139_v5 = vmul.f32 %v1060_v57, %v760_v50  ;;  %v950_v18 = vpop.permute.xlu1 %949  ;;  %v945_v15 = vpop.permute.xlu0 %944  ;;  %1176 = vst.msk [vmem:[#allocation2 + $0xe8] sm:$0xff] %vm1146_vm2, %v1121_v52  ;;  %v1925_v6 = vmul.f32 %v3218_v40, %v3213_v13  ;;  %v3236_v44 = vld [vmem:[#allocation2 + $0x32] sm:$0xff] }
  0xda   : > { %v1117_v31 = vmul.f32 %v950_v18, %v738_v51  ;;  %v1116_v3 = vmul.f32 %v945_v15, %v737_v33  ;;  %1155 = vst.msk [vmem:[#allocation2 + $0x40] sm:$0xff] %vm1146_vm2, %v1100_v53  ;;  %v3222_v9 = vpop.f32.mrf.mxu2  ;;  %v600_v50 = vpop.f32.mrf.mxu0  ;;  %v3232_v18 = vld [vmem:[#allocation2 + $0x38] sm:$0xff]  ;;  %v1662_v15 = vadd.f32 %v1630_v45, %v1564_v20  ;;  %v1859_v33 = vadd.f32 %v1827_v11, %v1759_v23 }
  0xdb   : > { %1194 = vst.msk [vmem:[#allocation2 + $0x178] sm:$0xff] %vm1146_vm2, %v1139_v5  ;;  %v601_v57 = vadd.f32 %v3009_v1, %v600_v50  ;;  %v3228_v60 = vpop.f32.mrf.mxu3  ;;  %v1728_v51 = vmul.f32 %v3190_v19, %v3230_v41  ;;  %v1828_v52 = vmul.f32 %v3204_v2, %v3232_v18  ;;  %v3249_v5 = vadd.f32 %v3009_v1, %v3052_v39 }
  0xdc   : > { %1172 = vst.msk [vmem:[#allocation2 + $0xc8] sm:$0xff] %vm1146_vm2, %v1117_v31  ;;  %v1957_v53 = vadd.f32 %v1925_v6, %v1859_v33  ;;  %v704_v11 = vadd.f32 %v3009_v1, %v3137_v8  ;;  %v2023_v20 = vmul.f32 %v3245_v4, %v3236_v44  ;;  %v3264_v23 = vadd.f32 %v3009_v1, %v3066_v47 }
  0xdd   : > { %1171 = vst.msk [vmem:[#allocation2 + $0xc0] sm:$0xff] %vm1146_vm2, %v1116_v3  ;;  %v722_v35 = vmax.f32 %v601_v57, 0.0  ;;  %v1760_v50 = vadd.f32 %v1728_v51, %v1662_v15  ;;  %v649_v39 = vadd.f32 %v3009_v1, %v3133_v63  ;;  %v1335_v63 = vmul.f32 %v3116_v21, %v3162_v34 }
  0xdf   : > { %v1101_v45 = vmul.f32 %v3033_v17, %v722_v35  ;;  %v3268_v17 = vadd.f32 %v3009_v1, %v3097_v25  ;;  %v1860_v33 = vadd.f32 %v1828_v52, %v1760_v50  ;;  %v2055_v35 = vadd.f32 %v2023_v20, %v1957_v53  ;;  %v3284_v25 = vld [vmem:[%s4310_s5] ss:$0 sm:$0xff] }
  0xe0   : > { %v3252_v54 = vpop.permute.xlu2 %984  ;;  %v763_v52 = vmax.f32 %v704_v11, 0.0  ;;  %v1237_v20 = vmul.f32 %v3129_v62, %v3153_v22  ;;  %v741_v34 = vmax.f32 %v649_v39, 0.0  ;;  %v1238_v11 = vmul.f32 %v3129_v62, %v3185_v10 }
  0xe1   : > { %v3256_v31 = vpop.permute.xlu1 %1039  ;;  %v3258_v3 = vpop.permute.xlu0 %1034  ;;  %1156 = vst.msk [vmem:[#allocation2 + $0x48] sm:$0xff] %vm1146_vm2, %v1101_v45  ;;  %v3273_v8 = vld [vmem:[#allocation2 + $0x39] sm:$0xff]  ;;  %v646_v45 = vadd.f32 %v3009_v1, %v3108_v38  ;;  %v2091_v38 = vadd.f32 %v3284_v25, %v2055_v35  ;;  %v1336_v22 = vmul.f32 %v3116_v21, %v3193_v24  ;;  %v1433_v39 = vmul.f32 %v3146_v12, %v3195_v30 }
  0xe2   : > { %4337 = vst [vmem:[#allocation13_spill] sm:$0xff] %v3256_v31  ;;  %v3275_v6 = vld [vmem:[#allocation2 + $0x3a] sm:$0xff]  ;;  %v3277_v57 = vpop.f32.mrf.mxu2  ;;  %v603_v15 = vpop.f32.mrf.mxu0  ;;  %v1926_v47 = vmul.f32 %v3218_v40, %v3273_v8  ;;  %v1533_v10 = vmul.f32 %v3151_v14, %v3197_v32  ;;  %v2000_v30 = vld [vmem:[#allocation2 + $0xb2] sm:$0xff] }
  0xe3   : > { %4338 = vst [vmem:[#allocation14_spill] sm:$0xff] %v3258_v3  ;;  %v604_v31 = vadd.f32 %v3009_v1, %v603_v15  ;;  %v2024_v53 = vmul.f32 %v3245_v4, %v3275_v6  ;;  %v710_v51 = vpop.f32.mrf.mxu3  ;;  %v1367_v15 = vadd.f32 %v1335_v63, %v1237_v20  ;;  %v1902_v63 = vld [vmem:[#allocation2 + $0xb1] sm:$0xff]  ;;  %v1631_v3 = vmul.f32 %v3158_v26, %v3213_v13 }
  0xe4   : > { %v1958_v50 = vadd.f32 %v1926_v47, %v1860_v33  ;;  %v1803_v33 = vld [vmem:[#allocation2 + $0xb0] sm:$0xff]  ;;  %v740_v47 = vmax.f32 %v646_v45, 0.0  ;;  %v711_v35 = vadd.f32 %v3009_v1, %v710_v51  ;;  %v2123_v45 = vmax.f32 %v2091_v38, 0.0 }
  0xe5   : > { %v723_v42 = vmax.f32 %v604_v31, 0.0  ;;  %v1465_v20 = vadd.f32 %v1433_v39, %v1367_v15  ;;  %v3329_v15 = vmul.f32 %v3245_v4, %v2000_v30 }
  0xe6   : > { %v2056_v0 = vadd.f32 %v2024_v53, %v1958_v50 }
  0xe7   : > { %v1102_v59 = vmul.f32 %v3031_v16, %v723_v42  ;;  %v3312_v16 = vadd.f32 %v3009_v1, %v3111_v43  ;;  %v1368_v43 = vadd.f32 %v1336_v22, %v1238_v11  ;;  %v1565_v38 = vadd.f32 %v1533_v10, %v1465_v20  ;;  %4339 = vst [vmem:[#allocation15_spill] sm:$0xff] %v3329_v15 }
  0xe8   : > { %v1075_v48 = vpop.permute.xlu2 %1074  ;;  %v2092_v53 = vadd.f32 %v3284_v25, %v2056_v0  ;;  %v1534_v11 = vmul.f32 %v3151_v14, %v3232_v18  ;;  %v1250_v10 = vmul.f32 %v3129_v62, %v1803_v33 }
  0xe9   : > { %v1142_v31 = vmul.f32 %v1075_v48, %v763_v52  ;;  %v965_v61 = vpop.permute.xlu1 %964  ;;  %v960_v50 = vpop.permute.xlu0 %959  ;;  %1157 = vst.msk [vmem:[#allocation2 + $0x50] sm:$0xff] %vm1146_vm2, %v1102_v59  ;;  %v3316_v48 = vmul.f32 %v3204_v2, %v1803_v33  ;;  %v1663_v22 = vadd.f32 %v1631_v3, %v1565_v38  ;;  %v1729_v3 = vmul.f32 %v3190_v19, %v3236_v44 }
  0xea   : > { %v1120_v42 = vmul.f32 %v965_v61, %v741_v34  ;;  %v1119_v24 = vmul.f32 %v960_v50, %v740_v47  ;;  %v658_v51 = vpop.f32.mrf.mxu2  ;;  %v605_v0 = vpop.f32.mrf.mxu0  ;;  %v2124_v52 = vmax.f32 %v2092_v53, 0.0  ;;  %v3325_v34 = vmul.f32 %v3218_v40, %v1902_v63 }
  0xeb   : > { %1197 = vst.msk [vmem:[#allocation2 + $0x190] sm:$0xff] %vm1146_vm2, %v1142_v31  ;;  %v659_v59 = vadd.f32 %v3009_v1, %v658_v51  ;;  %v606_v61 = vadd.f32 %v3009_v1, %v605_v0  ;;  %v766_v47 = vmax.f32 %v711_v35, 0.0  ;;  %v3334_v51 = vld [vmem:[#allocation2 + $0x48] sm:$0xff]  ;;  %v3340_v35 = vmul.f32 %v3151_v14, %v1803_v33 }
  0xec   : > { %1175 = vst.msk [vmem:[#allocation2 + $0xe0] sm:$0xff] %vm1146_vm2, %v1120_v42  ;;  %v2155_v31 = vpack.c.bf16 %v2124_v52, %v2123_v45  ;;  %v1434_v42 = vmul.f32 %v3146_v12, %v3230_v41  ;;  %v1348_v41 = vmul.f32 %v3116_v21, %v1902_v63  ;;  %v1829_v33 = vmul.f32 %v3204_v2, %v3334_v51 }
  0xed   : > { %1174 = vst.msk [vmem:[#allocation2 + $0xd8] sm:$0xff] %vm1146_vm2, %v1119_v24  ;;  %v745_v50 = vmax.f32 %v659_v59, 0.0  ;;  %v724_v53 = vmax.f32 %v606_v61, 0.0  ;;  %v1761_v15 = vadd.f32 %v1729_v3, %v1663_v22 }
  0xee   : > { %2584 = vmatmul.msk.bf16.vlgmr.msra.gmra.mxu1 %vm1146_vm2, %v2155_v31  ;;  %4340 = vst [vmem:[#allocation16_spill] sm:$0xff] %v3340_v35  ;;  %v1466_v52 = vadd.f32 %v1434_v42, %v1368_v43  ;;  %v1632_v31 = vmul.f32 %v3158_v26, %v3273_v8  ;;  %v4341_v43 = vmax.f32 %v3264_v23, 0.0  ;;  %v3367_v35 = vmul.f32 %v3158_v26, %v1902_v63 }
  0xef   : > { %v1124_v24 = vmul.f32 %v3252_v54, %v745_v50  ;;  %v1103_v0 = vmul.f32 %v2972_v46, %v724_v53  ;;  %v654_v46 = vadd.f32 %v3009_v1, %v3222_v9  ;;  %v656_v54 = vadd.f32 %v3009_v1, %v3277_v57 }
  0xf0   : > { %v1090_v45 = vpop.permute.xlu2 %1089  ;;  %v3352_v38 = vld [vmem:[#allocation2 + $0x49] sm:$0xff]  ;;  %v4342_v50 = vmax.f32 %v3249_v5, 0.0  ;;  %v1566_v39 = vadd.f32 %v1534_v11, %v1466_v52  ;;  %v1446_v11 = vmul.f32 %v3146_v12, %v2000_v30  ;;  %v1337_v63 = vmul.f32 %v3116_v21, %v3213_v13 }
  0xf1   : > { %v1145_v20 = vmul.f32 %v1090_v45, %v766_v47  ;;  %v1055_v59 = vpop.permute.xlu1 %1054  ;;  %v1050_v61 = vpop.permute.xlu0 %1049  ;;  %1179 = vst.msk [vmem:[#allocation2 + $0x100] sm:$0xff] %vm1146_vm2, %v1124_v24  ;;  %v1927_v9 = vmul.f32 %v3218_v40, %v3352_v38  ;;  %v3372_v5 = vld [vmem:[#allocation2 + $0x50] sm:$0xff]  ;;  %v3375_v24 = vmul.f32 %v3190_v19, %v2000_v30  ;;  %v1380_v52 = vadd.f32 %v1348_v41, %v1250_v10 }
  0xf2   : > { %v1138_v47 = vmul.f32 %v1055_v59, %v4341_v43  ;;  %v1137_v53 = vmul.f32 %v1050_v61, %v4342_v50  ;;  %1158 = vst.msk [vmem:[#allocation2 + $0x58] sm:$0xff] %vm1146_vm2, %v1103_v0  ;;  %v660_v42 = vpop.f32.mrf.mxu2  ;;  %v608_v45 = vpop.f32.mrf.mxu0  ;;  %v1664_v22 = vadd.f32 %v1632_v31, %v1566_v39  ;;  %v1861_v0 = vadd.f32 %v1829_v33, %v1761_v15  ;;  %v3382_v43 = vld [vmem:[#allocation2 + $0x4a] sm:$0xff] }
  0xf3   : > { %1200 = vst.msk [vmem:[#allocation2 + $0x1a8] sm:$0xff] %vm1146_vm2, %v1145_v20  ;;  %v661_v23 = vadd.f32 %v3009_v1, %v660_v42  ;;  %v609_v57 = vadd.f32 %v3009_v1, %v608_v45  ;;  %v743_v20 = vmax.f32 %v654_v46, 0.0  ;;  %v744_v59 = vmax.f32 %v656_v54, 0.0 }
  0xf4   : > { %1193 = vst.msk [vmem:[#allocation2 + $0x170] sm:$0xff] %vm1146_vm2, %v1138_v47  ;;  %v1730_v50 = vmul.f32 %v3190_v19, %v3275_v6  ;;  %v1830_v30 = vmul.f32 %v3204_v2, %v3372_v5  ;;  %v1959_v39 = vadd.f32 %v1927_v9, %v1861_v0  ;;  %v1239_v15 = vmul.f32 %v3129_v62, %v3197_v32 }
  0xf5   : > { %1192 = vst.msk [vmem:[#allocation2 + $0x168] sm:$0xff] %vm1146_vm2, %v1137_v53  ;;  %v746_v61 = vmax.f32 %v661_v23, 0.0  ;;  %v725_v3 = vmax.f32 %v609_v57, 0.0  ;;  %v3392_v13 = vadd.f32 %v3009_v1, %v3183_v7  ;;  %v1338_v31 = vmul.f32 %v3116_v21, %v3273_v8 }
  0xf6   : > { %v3400_v33 = vadd.f32 %v3009_v1, %v3228_v60  ;;  %v1762_v47 = vadd.f32 %v1730_v50, %v1664_v22  ;;  %v2025_v32 = vmul.f32 %v3245_v4, %v3382_v43  ;;  %v1369_v53 = vadd.f32 %v1337_v63, %v1239_v15  ;;  %v3416_v63 = vld [vmem:[#allocation2 + $0xc8] sm:$0xff] }
  0xf7   : > { %v1125_v10 = vmul.f32 %v3041_v27, %v746_v61  ;;  %v1104_v41 = vmul.f32 %v3045_v29, %v725_v3  ;;  %v1240_v8 = vmul.f32 %v3129_v62, %v3232_v18  ;;  %v1478_v60 = vadd.f32 %v1446_v11, %v1380_v52 }
  0xf8   : > { %v1862_v23 = vadd.f32 %v1830_v30, %v1762_v47  ;;  %v2057_v22 = vadd.f32 %v2025_v32, %v1959_v39  ;;  %v1435_v0 = vmul.f32 %v3146_v12, %v3236_v44  ;;  %v765_v61 = vmax.f32 %v3400_v33, 0.0  ;;  %v1903_v30 = vld [vmem:[#allocation2 + $0xc1] sm:$0xff] }
  0xf9   : > { %v980_v46 = vpop.permute.xlu1 %979  ;;  %v975_v54 = vpop.permute.xlu0 %974  ;;  %1180 = vst.msk [vmem:[#allocation2 + $0x108] sm:$0xff] %vm1146_vm2, %v1125_v10  ;;  %v3405_v42 = vld [vmem:[#allocation2 + $0x51] sm:$0xff]  ;;  %v1370_v52 = vadd.f32 %v1338_v31, %v1240_v8  ;;  %v1436_v10 = vmul.f32 %v3146_v12, %v3275_v6  ;;  %v1904_v31 = vld [vmem:[#allocation2 + $0xc9] sm:$0xff] }
  0xfa   : > { %v1123_v7 = vmul.f32 %v980_v46, %v744_v59  ;;  %v1122_v27 = vmul.f32 %v975_v54, %v743_v20  ;;  %v3407_v29 = vld [vmem:[#allocation2 + $0x52] sm:$0xff]  ;;  %1159 = vst.msk [vmem:[#allocation2 + $0x60] sm:$0xff] %vm1146_vm2, %v1104_v41  ;;  %v663_v45 = vpop.f32.mrf.mxu2  ;;  %v610_v9 = vpop.f32.mrf.mxu0  ;;  %v1928_v57 = vmul.f32 %v3218_v40, %v3405_v42  ;;  %v1804_v59 = vld [vmem:[#allocation2 + $0xc0] sm:$0xff]  ;;  %v1467_v50 = vadd.f32 %v1435_v0, %v1369_v53  ;;  %v2002_v53 = vld [vmem:[#allocation2 + $0xca] sm:$0xff] }
  0xfb   : > { %v664_v18 = vadd.f32 %v3009_v1, %v663_v45  ;;  %v611_v11 = vadd.f32 %v3009_v1, %v610_v9  ;;  %v2026_v44 = vmul.f32 %v3245_v4, %v3407_v29  ;;  %v3430_v41 = vmul.f32 %v3204_v2, %v3416_v63  ;;  %v3432_v46 = vld [vmem:[#allocation2 + $0xc2] sm:$0xff] }
  0xfc   : > { %1178 = vst.msk [vmem:[#allocation2 + $0xf8] sm:$0xff] %vm1146_vm2, %v1123_v7  ;;  %v1960_v3 = vadd.f32 %v1928_v57, %v1862_v23  ;;  %v2093_v47 = vadd.f32 %v3284_v25, %v2057_v22  ;;  %v3436_v32 = vmul.f32 %v3204_v2, %v1804_v59  ;;  %v1546_v7 = vmul.f32 %v3151_v14, %v3416_v63 }
  0xfd   : > { %1177 = vst.msk [vmem:[#allocation2 + $0xf0] sm:$0xff] %vm1146_vm2, %v1122_v27  ;;  %v747_v39 = vmax.f32 %v664_v18, 0.0  ;;  %v726_v15 = vmax.f32 %v611_v11, 0.0  ;;  %v1468_v8 = vadd.f32 %v1436_v10, %v1370_v52  ;;  %v3443_v45 = vmul.f32 %v3218_v40, %v1903_v30 }
  0xfe   : > { %v2058_v54 = vadd.f32 %v2026_v44, %v1960_v3  ;;  %v1535_v22 = vmul.f32 %v3151_v14, %v3334_v51  ;;  %v3449_v0 = vmul.f32 %v3218_v40, %v1904_v31  ;;  %v3453_v18 = vmul.f32 %v3245_v4, %v3432_v46 }
  0xff   : > { %v1126_v27 = vmul.f32 %v3104_v37, %v747_v39  ;;  %v1105_v6 = vmul.f32 %v3043_v28, %v726_v15  ;;  %v4343_v28 = vmax.f32 %v3312_v16, 0.0  ;;  %v4344_v11 = vmax.f32 %v3268_v17, 0.0 }
 0x100   : > { %v2094_v57 = vadd.f32 %v3284_v25, %v2058_v54  ;;  %v3461_v3 = vmul.f32 %v3245_v4, %v2002_v53  ;;  %v3464_v44 = vmul.f32 %v3151_v14, %v1804_v59  ;;  %v2125_v10 = vmax.f32 %v2093_v47, 0.0 }
 0x101   : > { %v1070_v9 = vpop.permute.xlu1 %1069  ;;  %v1065_v23 = vpop.permute.xlu0 %1064  ;;  %1181 = vst.msk [vmem:[#allocation2 + $0x110] sm:$0xff] %vm1146_vm2, %v1126_v27  ;;  %v1633_v27 = vmul.f32 %v3158_v26, %v3352_v38  ;;  %v1578_v16 = vadd.f32 %v1546_v7, %v1478_v60  ;;  %v3481_v60 = vmul.f32 %v3190_v19, %v3432_v46 }
 0x102   : > { %v1141_v37 = vmul.f32 %v1070_v9, %v4343_v28  ;;  %v1140_v52 = vmul.f32 %v1065_v23, %v4344_v11  ;;  %4345 = vst [vmem:[#allocation17_spill] sm:$0xff] %v3461_v3  ;;  %v665_v39 = vpop.f32.mrf.mxu2  ;;  %v613_v15 = vpop.f32.mrf.mxu0  ;;  %v2126_v54 = vmax.f32 %v2094_v57, 0.0  ;;  %v1241_v23 = vmul.f32 %v3129_v62, %v3334_v51  ;;  %v3483_v11 = vld [vmem:[#allocation2 + $0x60] sm:$0xff] }
 0x103   : > { %4346 = vst [vmem:[#allocation18_spill] sm:$0xff] %v3464_v44  ;;  %v666_v17 = vadd.f32 %v3009_v1, %v665_v39  ;;  %v614_v9 = vadd.f32 %v3009_v1, %v613_v15  ;;  %v3475_v28 = vmul.f32 %v3158_v26, %v1903_v30  ;;  %v1644_v57 = vmul.f32 %v3158_v26, %v1904_v31 }
 0x104   : > { %1160 = vst.msk [vmem:[#allocation2 + $0x68] sm:$0xff] %vm1146_vm2, %v1105_v6  ;;  %v2156_v47 = vpack.c.bf16 %v2126_v54, %v2125_v10  ;;  %v1567_v6 = vadd.f32 %v1535_v22, %v1467_v50  ;;  %v1742_v39 = vmul.f32 %v3190_v19, %v2002_v53  ;;  %v1251_v51 = vmul.f32 %v3129_v62, %v1804_v59 }
 0x105   : > { %1196 = vst.msk [vmem:[#allocation2 + $0x188] sm:$0xff] %vm1146_vm2, %v1141_v37  ;;  %v748_v7 = vmax.f32 %v666_v17, 0.0  ;;  %v727_v37 = vmax.f32 %v614_v9, 0.0  ;;  %v1676_v22 = vadd.f32 %v1644_v57, %v1578_v16  ;;  %v1252_v15 = vmul.f32 %v3129_v62, %v3416_v63 }
 0x106   : > { %4347 = vst [vmem:[#allocation19_spill] sm:$0xff] %v3475_v28  ;;  %2585 = vmatmul.msk.bf16.gmra.mxu1 %vm1146_vm2, %v2156_v47  ;;  %v1665_v50 = vadd.f32 %v1633_v27, %v1567_v6  ;;  %v1349_v17 = vmul.f32 %v3116_v21, %v1903_v30  ;;  %v1350_v9 = vmul.f32 %v3116_v21, %v1904_v31  ;;  %v4349_v63 = vmax.f32 %v3392_v13, 0.0  ;;  %v3511_v6 = vld [vmem:[#allocation2 + $0xe0] sm:$0xff] }
 0x107   : > { %1195 = vst.msk [vmem:[#allocation2 + $0x180] sm:$0xff] %vm1146_vm2, %v1140_v52  ;;  %v1536_v52 = vmul.f32 %v3151_v14, %v3372_v5  ;;  %v1127_v10 = vmul.f32 %v3102_v36, %v748_v7  ;;  %v1106_v54 = vmul.f32 %v2989_v56, %v727_v37  ;;  %v1634_v47 = vmul.f32 %v3158_v26, %v3405_v42 }
 0x108   : > { %4348 = vst [vmem:[#allocation20_spill] sm:$0xff] %v3481_v60  ;;  %v1731_v27 = vmul.f32 %v3190_v19, %v3382_v43  ;;  %v1831_v16 = vmul.f32 %v3204_v2, %v3483_v11  ;;  %v1339_v36 = vmul.f32 %v3116_v21, %v3352_v38  ;;  %v3515_v57 = vmul.f32 %v3146_v12, %v3432_v46 }
 0x109   : > { %v1085_v20 = vpop.permute.xlu1 %1084  ;;  %v1080_v59 = vpop.permute.xlu0 %1079  ;;  %1182 = vst.msk [vmem:[#allocation2 + $0x118] sm:$0xff] %vm1146_vm2, %v1127_v10  ;;  %v3518_v7 = vmul.f32 %v3146_v12, %v2002_v53  ;;  %v1568_v33 = vadd.f32 %v1536_v52, %v1468_v8  ;;  %v3528_v53 = vadd.f32 %v1349_v17, %v1251_v51  ;;  %v1242_v51 = vmul.f32 %v3129_v62, %v3372_v5 }
 0x10a   : > { %v1144_v56 = vmul.f32 %v1085_v20, %v765_v61  ;;  %v1143_v30 = vmul.f32 %v1080_v59, %v4349_v63  ;;  %4350 = vst [vmem:[#allocation21_spill] sm:$0xff] %v3511_v6  ;;  %v668_v38 = vpop.f32.mrf.mxu2  ;;  %v615_v37 = vpop.f32.mrf.mxu0  ;;  %v1763_v20 = vadd.f32 %v1731_v27, %v1665_v50  ;;  %v1774_v61 = vadd.f32 %v1742_v39, %v1676_v22  ;;  %v3537_v22 = vld [vmem:[#allocation2 + $0xd9] sm:$0xff] }
 0x10b   : > { %v3509_v31 = vld [vmem:[#allocation2 + $0x61] sm:$0xff]  ;;  %4351 = vst [vmem:[#allocation22_spill] sm:$0xff] %v3518_v7  ;;  %v669_v10 = vadd.f32 %v3009_v1, %v668_v38  ;;  %v616_v46 = vadd.f32 %v3009_v1, %v615_v37  ;;  %v3530_v63 = vadd.f32 %v1350_v9, %v1252_v15  ;;  %v1666_v8 = vadd.f32 %v1634_v47, %v1568_v33 }
 0x10c   : > { %1161 = vst.msk [vmem:[#allocation2 + $0x70] sm:$0xff] %vm1146_vm2, %v1106_v54  ;;  %v1929_v13 = vmul.f32 %v3218_v40, %v3509_v31  ;;  %v3526_v59 = vld [vmem:[#allocation2 + $0x68] sm:$0xff]  ;;  %v1863_v52 = vadd.f32 %v1831_v16, %v1763_v20  ;;  %v1371_v50 = vadd.f32 %v1339_v36, %v1241_v23  ;;  %v3533_v54 = vld [vmem:[#allocation2 + $0xd8] sm:$0xff]  ;;  %v1842_v39 = vmul.f32 %v3204_v2, %v3511_v6 }
 0x10d   : > { %1199 = vst.msk [vmem:[#allocation2 + $0x1a0] sm:$0xff] %vm1146_vm2, %v1144_v56  ;;  %v749_v27 = vmax.f32 %v669_v10, 0.0  ;;  %v728_v56 = vmax.f32 %v616_v46, 0.0  ;;  %v3539_v38 = vld [vmem:[#allocation2 + $0x62] sm:$0xff]  ;;  %v1437_v15 = vmul.f32 %v3146_v12, %v3382_v43  ;;  %v1732_v23 = vmul.f32 %v3190_v19, %v3407_v29  ;;  %v3553_v36 = vld [vmem:[#allocation2 + $0xda] sm:$0xff]  ;;  %v3569_v10 = vld [vmem:[#allocation2 + $0x170] sm:$0xff] }
 0x10e   : > { %4352 = vst [vmem:[#allocation23_spill] sm:$0xff] %v3530_v63  ;;  %v1832_v17 = vmul.f32 %v3204_v2, %v3526_v59  ;;  %v1961_v9 = vadd.f32 %v1929_v13, %v1863_v52  ;;  %v1340_v47 = vmul.f32 %v3116_v21, %v3405_v42  ;;  %v3551_v16 = vld [vmem:[#allocation2 + $0xe1] sm:$0xff]  ;;  %v3561_v37 = vmul.f32 %v3204_v2, %v3533_v54  ;;  %v3571_v46 = vld [vmem:[#allocation2 + $0x171] sm:$0xff] }
 0x10f   : > { %1198 = vst.msk [vmem:[#allocation2 + $0x198] sm:$0xff] %vm1146_vm2, %v1143_v30  ;;  %v3555_v30 = vld [vmem:[#allocation2 + $0xe2] sm:$0xff]  ;;  %v1128_v5 = vmul.f32 %v3124_v58, %v749_v27  ;;  %v1107_v43 = vmul.f32 %v3059_v49, %v728_v56  ;;  %v3565_v33 = vmul.f32 %v3218_v40, %v3537_v22  ;;  %v1764_v20 = vadd.f32 %v1732_v23, %v1666_v8 }
 0x110   : > { %4353 = vst [vmem:[#allocation24_spill] sm:$0xff] %v3533_v54  ;;  %v2027_v42 = vmul.f32 %v3245_v4, %v3539_v38  ;;  %v1469_v13 = vadd.f32 %v1437_v15, %v1371_v50  ;;  %v1874_v58 = vadd.f32 %v1842_v39, %v1774_v61  ;;  %v1438_v27 = vmul.f32 %v3146_v12, %v3407_v29  ;;  %v3580_v56 = vld [vmem:[#allocation2 + $0x168] sm:$0xff] }
 0x111   : > { %4354 = vst [vmem:[#allocation25_spill] sm:$0xff] %v3537_v22  ;;  %v1940_v8 = vmul.f32 %v3218_v40, %v3551_v16  ;;  %v3586_v50 = vmul.f32 %v3245_v4, %v3553_v36  ;;  %v2038_v61 = vmul.f32 %v3245_v4, %v3555_v30  ;;  %v1864_v23 = vadd.f32 %v1832_v17, %v1764_v20  ;;  %v1223_v6 = vld [vmem:[#allocation2 + $0x108] sm:$0xff] }
 0x112   : > { %4355 = vst [vmem:[#allocation26_spill] sm:$0xff] %v3551_v16  ;;  %v670_v39 = vpop.f32.mrf.mxu2  ;;  %v618_v15 = vpop.f32.mrf.mxu0  ;;  %v3595_v16 = vld [vmem:[#allocation2 + $0x16a] sm:$0xff]  ;;  %v3605_v17 = vmul.f32 %v3218_v40, %v3571_v46  ;;  %v1537_v28 = vmul.f32 %v3151_v14, %v3483_v11  ;;  %v3634_v3 = vmul.f32 %v3151_v14, %v3580_v56 }
 0x113   : > { %4356 = vst [vmem:[#allocation27_spill] sm:$0xff] %v3553_v36  ;;  %v3574_v49 = vld [vmem:[#allocation2 + $0x69] sm:$0xff]  ;;  %v671_v36 = vadd.f32 %v3009_v1, %v670_v39  ;;  %v1972_v20 = vadd.f32 %v1940_v8, %v1874_v58  ;;  %v4370_v58 = vld [vmem:[#allocation5_spill] sm:$0xff] }
 0x114   : > { %4357 = vst [vmem:[#allocation28_spill] sm:$0xff] %v3555_v30  ;;  %v3576_v52 = vld [vmem:[#allocation2 + $0x6a] sm:$0xff]  ;;  %v1930_v29 = vmul.f32 %v3218_v40, %v3574_v49  ;;  %v3601_v30 = vmul.f32 %v3204_v2, %v3569_v10 }
 0x115   : > { %4358 = vst [vmem:[#allocation29_spill] sm:$0xff] %v3561_v37  ;;  %v3593_v37 = vld [vmem:[#allocation2 + $0x169] sm:$0xff] }
 0x116   : > { %4359 = vst [vmem:[#allocation30_spill] sm:$0xff] %v3565_v33  ;;  %v1372_v33 = vadd.f32 %v1340_v47, %v1242_v51  ;;  %v2028_v51 = vmul.f32 %v3245_v4, %v3576_v52  ;;  %v3613_v47 = vld [vmem:[#allocation2 + $0x172] sm:$0xff]  ;;  %v1321_v39 = vld [vmem:[#allocation2 + $0x109] sm:$0xff] }
 0x117   : > { %4360 = vst [vmem:[#allocation31_spill] sm:$0xff] %v3569_v10 }
 0x118   : > { %4361 = vst [vmem:[#allocation32_spill] sm:$0xff] %v3571_v46  ;;  %v1470_v22 = vadd.f32 %v1438_v27, %v1372_v33  ;;  %v1355_v33 = vmul.f32 %v3116_v21, %v1321_v39  ;;  %v2070_v27 = vadd.f32 %v2038_v61, %v1972_v20 }
 0x119   : > { %1183 = vst.msk [vmem:[#allocation2 + $0x120] sm:$0xff] %vm1146_vm2, %v1128_v5  ;;  %v2059_v5 = vadd.f32 %v2027_v42, %v1961_v9  ;;  %v3611_v9 = vmul.f32 %v3204_v2, %v3580_v56 }
 0x11a   : > { %4362 = vst [vmem:[#allocation33_spill] sm:$0xff] %v3580_v56  ;;  %v673_v61 = vpop.f32.mrf.mxu2  ;;  %v620_v20 = vpop.f32.mrf.mxu0 }
 0x11b   : > { %4363 = vst [vmem:[#allocation34_spill] sm:$0xff] %v3586_v50  ;;  %v619_v50 = vadd.f32 %v3009_v1, %v618_v15  ;;  %v750_v1 = vmax.f32 %v671_v36, 0.0  ;;  %v3617_v15 = vmul.f32 %v3218_v40, %v3593_v37  ;;  %v2095_v60 = vadd.f32 %v3284_v25, %v2059_v5 }
 0x11c   : > { %1162 = vst.msk [vmem:[#allocation2 + $0x78] sm:$0xff] %vm1146_vm2, %v1107_v43  ;;  %v1962_v43 = vadd.f32 %v1930_v29, %v1864_v23  ;;  %v3621_v23 = vmul.f32 %v3245_v4, %v3595_v16  ;;  %v3640_v5 = vmul.f32 %v3151_v14, %v3569_v10 }
 0x11d   : > { %4364 = vst [vmem:[#allocation35_spill] sm:$0xff] %v3593_v37  ;;  %v729_v42 = vmax.f32 %v619_v50, 0.0  ;;  %v1129_v36 = vmul.f32 %v3122_v55, %v750_v1  ;;  %v3630_v50 = vmul.f32 %v3245_v4, %v3613_v47  ;;  %v1635_v55 = vmul.f32 %v3158_v26, %v3509_v31  ;;  %v1322_v1 = vld [vmem:[#allocation2 + $0x111] sm:$0xff] }
 0x11e   : > { %4365 = vst [vmem:[#allocation36_spill] sm:$0xff] %v3595_v16  ;;  %v2060_v29 = vadd.f32 %v2028_v51, %v1962_v43  ;;  %v1257_v51 = vmul.f32 %v3129_v62, %v1223_v6  ;;  %v2127_v39 = vmax.f32 %v2095_v60, 0.0  ;;  %v3660_v6 = vld [vmem:[%s4308_s3] ss:$0 sm:$0xff] }
 0x11f   : > { %4366 = vst [vmem:[#allocation37_spill] sm:$0xff] %v3605_v17  ;;  %v1108_v8 = vmul.f32 %v4370_v58, %v729_v42  ;;  %v1243_v42 = vmul.f32 %v3129_v62, %v3483_v11  ;;  %v674_v11 = vadd.f32 %v3660_v6, %v673_v61 }
 0x120   : > { %4367 = vst [vmem:[#allocation38_spill] sm:$0xff] %v3613_v47  ;;  %v2096_v43 = vadd.f32 %v3284_v25, %v2060_v29  ;;  %v3650_v29 = vmul.f32 %v3158_v26, %v3593_v37  ;;  %v1224_v37 = vld [vmem:[#allocation2 + $0x110] sm:$0xff] }
 0x121   : > { %4368 = vst [vmem:[#allocation39_spill] sm:$0xff] %v3617_v15  ;;  %v751_v10 = vmax.f32 %v674_v11, 0.0  ;;  %v3858_v15 = vld [vmem:[%s4309_s4 + $0x6] ss:$0 sm:$0xff] }
 0x122   : > { %4369 = vst [vmem:[#allocation40_spill] sm:$0xff] %v3621_v23  ;;  %v2128_v58 = vmax.f32 %v2096_v43, 0.0  ;;  %v1387_v43 = vadd.f32 %v1355_v33, %v1257_v51  ;;  %v1341_v23 = vmul.f32 %v3116_v21, %v3509_v31  ;;  %v1733_v33 = vmul.f32 %v3190_v19, %v3539_v38  ;;  %v1420_v31 = vld [vmem:[#allocation2 + $0x112] sm:$0xff] }
 0x123   : > { %4371 = vst [vmem:[#allocation5_spill] sm:$0xff] %v3630_v50  ;;  %v1258_v51 = vmul.f32 %v3129_v62, %v1224_v37  ;;  %v1244_v37 = vmul.f32 %v3129_v62, %v3526_v59 }
 0x124   : > { %4372 = vst [vmem:[#allocation41_spill] sm:$0xff] %v3634_v3  ;;  %v2157_v60 = vpack.c.bf16 %v2128_v58, %v2127_v39  ;;  %v1636_v39 = vmul.f32 %v3158_v26, %v3574_v49 }
 0x125   : > { %4373 = vst [vmem:[#allocation42_spill] sm:$0xff] %v3640_v5  ;;  %v3655_v5 = vmul.f32 %v3158_v26, %v3571_v46  ;;  %v3672_v46 = vadd.f32 %v3284_v25, %v2070_v27  ;;  %v3686_v27 = vmul.f32 %v3190_v19, %v3613_v47  ;;  %v1342_v47 = vmul.f32 %v3116_v21, %v3574_v49 }
 0x126   : > { %1184 = vst.msk [vmem:[#allocation2 + $0x128] sm:$0xff] %vm1146_vm2, %v1129_v36  ;;  %v1569_v36 = vadd.f32 %v1537_v28, %v1469_v13  ;;  %v3668_v28 = vmul.f32 %v3190_v19, %v3595_v16  ;;  %v1356_v13 = vmul.f32 %v3116_v21, %v1322_v1  ;;  %2586 = vmatmul.msk.bf16.gmra.mxu1 %vm1146_vm2, %v2157_v60  ;;  %v1518_v60 = vld [vmem:[#allocation2 + $0x120] sm:$0xff] }
 0x127   : > { %4374 = vst [vmem:[#allocation43_spill] sm:$0xff] %v3650_v29  ;;  %v621_v29 = vadd.f32 %v3660_v6, %v620_v20  ;;  %v3674_v20 = vld [vmem:[#allocation2 + $0x78] sm:$0xff]  ;;  %v1454_v49 = vmul.f32 %v3146_v12, %v1420_v31 }
 0x128   : > { %1163 = vst.msk [vmem:[#allocation2 + $0x80] sm:$0xff] %vm1146_vm2, %v1108_v8  ;;  %v1538_v8 = vmul.f32 %v3151_v14, %v3526_v59  ;;  %v1667_v3 = vadd.f32 %v1635_v55, %v1569_v36  ;;  %v4379_v55 = vld [vmem:[#allocation6_spill] sm:$0xff]  ;;  %v1388_v16 = vadd.f32 %v1356_v13, %v1258_v51  ;;  %v675_v13 = vpop.f32.mrf.mxu2  ;;  %v623_v51 = vpop.f32.mrf.mxu0 }
 0x129   : > { %4375 = vst [vmem:[#allocation44_spill] sm:$0xff] %v3655_v5  ;;  %v1419_v5 = vld [vmem:[#allocation2 + $0x10a] sm:$0xff]  ;;  %v730_v61 = vmax.f32 %v621_v29, 0.0  ;;  %v1130_v1 = vmul.f32 %v4379_v55, %v751_v10 }
 0x12a   : > { %4376 = vst [vmem:[#allocation45_spill] sm:$0xff] %v3668_v28  ;;  %v4380_v29 = vld [vmem:[#allocation3_spill] sm:$0xff]  ;;  %v1570_v36 = vadd.f32 %v1538_v8, %v1470_v22  ;;  %v1453_v11 = vmul.f32 %v3146_v12, %v1419_v5  ;;  %v1765_v10 = vadd.f32 %v1733_v33, %v1667_v3  ;;  %v1373_v5 = vadd.f32 %v1341_v23, %v1243_v42 }
 0x12b   : > { %4377 = vst [vmem:[#allocation46_spill] sm:$0xff] %v3672_v46  ;;  %v1109_v58 = vmul.f32 %v4380_v29, %v730_v61  ;;  %v1833_v46 = vmul.f32 %v3204_v2, %v3674_v20  ;;  %v1439_v61 = vmul.f32 %v3146_v12, %v3539_v38  ;;  %v1553_v3 = vmul.f32 %v3151_v14, %v1518_v60 }
 0x12c   : > { %4378 = vst [vmem:[#allocation47_spill] sm:$0xff] %v3686_v27  ;;  %v1485_v22 = vadd.f32 %v1453_v11, %v1387_v43  ;;  %v1668_v59 = vadd.f32 %v1636_v39, %v1570_v36  ;;  %v676_v43 = vadd.f32 %v3660_v6, %v675_v13  ;;  %v624_v33 = vadd.f32 %v3660_v6, %v623_v51 }
 0x12d   : > { %1185 = vst.msk [vmem:[#allocation2 + $0x130] sm:$0xff] %vm1146_vm2, %v1130_v1  ;;  %v3700_v8 = vld [vmem:[#allocation2 + $0x121] sm:$0xff]  ;;  %v1734_v23 = vmul.f32 %v3190_v19, %v3576_v52  ;;  %v1440_v42 = vmul.f32 %v3146_v12, %v3576_v52  ;;  %v1865_v39 = vadd.f32 %v1833_v46, %v1765_v10  ;;  %v1486_v1 = vadd.f32 %v1454_v49, %v1388_v16  ;;  %v4381_v16 = vld [vmem:[#allocation12_spill] sm:$0xff] }
 0x12e   : > { %1164 = vst.msk [vmem:[#allocation2 + $0x88] sm:$0xff] %vm1146_vm2, %v1109_v58  ;;  %v1519_v29 = vld [vmem:[#allocation2 + $0x128] sm:$0xff]  ;;  %v1651_v58 = vmul.f32 %v3158_v26, %v3700_v8  ;;  %v1374_v36 = vadd.f32 %v1342_v47, %v1244_v37  ;;  %v752_v31 = vmax.f32 %v676_v43, 0.0  ;;  %v731_v11 = vmax.f32 %v624_v33, 0.0  ;;  %v4382_v10 = vld [vmem:[#allocation8_spill] sm:$0xff] }
 0x12f   : > { %v3698_v55 = vld [vmem:[#allocation2 + $0x79] sm:$0xff]  ;;  %v1471_v27 = vadd.f32 %v1439_v61, %v1373_v5  ;;  %v1539_v51 = vmul.f32 %v3151_v14, %v3674_v20  ;;  %v1766_v28 = vadd.f32 %v1734_v23, %v1668_v59  ;;  %v1585_v12 = vadd.f32 %v1553_v3, %v1485_v22  ;;  %v1715_v46 = vld [vmem:[#allocation2 + $0x122] sm:$0xff] }
 0x130   : > { %v1931_v21 = vmul.f32 %v3218_v40, %v3698_v55  ;;  %v3713_v38 = vld [vmem:[#allocation2 + $0x80] sm:$0xff]  ;;  %v1131_v52 = vmul.f32 %v4381_v16, %v752_v31  ;;  %v1110_v49 = vmul.f32 %v4382_v10, %v731_v11  ;;  %v1554_v47 = vmul.f32 %v3151_v14, %v1519_v29 }
 0x131   : > { %v1995_v13 = vld [vmem:[#allocation2 + $0x7a] sm:$0xff]  ;;  %v1834_v56 = vmul.f32 %v3204_v2, %v3713_v38  ;;  %v1540_v37 = vmul.f32 %v3151_v14, %v3713_v38  ;;  %v1683_v61 = vadd.f32 %v1651_v58, %v1585_v12  ;;  %v1472_v43 = vadd.f32 %v1440_v42, %v1374_v36  ;;  %v625_v42 = vpop.f32.mrf.mxu0 }
 0x132   : > { %v1963_v50 = vadd.f32 %v1931_v21, %v1865_v39  ;;  %v2029_v5 = vmul.f32 %v3245_v4, %v1995_v13  ;;  %v1259_v59 = vmul.f32 %v3129_v62, %v1518_v60  ;;  %1186 = vst.msk [vmem:[#allocation2 + $0x138] sm:$0xff] %vm1146_vm2, %v1131_v52  ;;  %v1749_v3 = vmul.f32 %v3190_v19, %v1715_v46  ;;  %v678_v39 = vpop.f32.mrf.mxu2  ;;  %v3743_v31 = vld [vmem:[%s4309_s4] ss:$0 sm:$0xff] }
 0x133   : > { %v1571_v33 = vadd.f32 %v1539_v51, %v1471_v27  ;;  %v1637_v23 = vmul.f32 %v3158_v26, %v3698_v55  ;;  %v1245_v14 = vmul.f32 %v3129_v62, %v3674_v20  ;;  %1165 = vst.msk [vmem:[#allocation2 + $0x90] sm:$0xff] %vm1146_vm2, %v1110_v49  ;;  %v1866_v58 = vadd.f32 %v1834_v56, %v1766_v28 }
 0x134   : > { %v2061_v36 = vadd.f32 %v2029_v5, %v1963_v50  ;;  %v1260_v27 = vmul.f32 %v3743_v31, %v1519_v29  ;;  %v679_v11 = vadd.f32 %v3660_v6, %v678_v39  ;;  %v626_v51 = vadd.f32 %v3660_v6, %v625_v42  ;;  %v1618_v20 = vld [vmem:[#allocation2 + $0x129] sm:$0xff]  ;;  %v3756_v29 = vld [vmem:[%s4309_s4 + $0x1] ss:$0 sm:$0xff]  ;;  %v3769_v39 = vld [vmem:[%s4309_s4 + $0x5] ss:$0 sm:$0xff] }
 0x135   : > { %v1898_v21 = vld [vmem:[#allocation2 + $0x81] sm:$0xff]  ;;  %v1586_v62 = vadd.f32 %v1554_v47, %v1486_v1  ;;  %v1572_v12 = vadd.f32 %v1540_v37, %v1472_v43  ;;  %v1735_v50 = vmul.f32 %v3190_v19, %v1995_v13  ;;  %v1669_v10 = vadd.f32 %v1637_v23, %v1571_v33  ;;  %v1716_v5 = vld [vmem:[#allocation2 + $0x12a] sm:$0xff] }
 0x136   : > { %v3731_v22 = vld [vmem:[#allocation2 + $0x82] sm:$0xff]  ;;  %v1932_v60 = vmul.f32 %v3218_v40, %v1898_v21  ;;  %v3750_v40 = vadd.f32 %v1749_v3, %v1683_v61  ;;  %v753_v28 = vmax.f32 %v679_v11, 0.0  ;;  %v732_v52 = vmax.f32 %v626_v51, 0.0  ;;  %v4383_v43 = vld [vmem:[#allocation11_spill] sm:$0xff] }
 0x137   : > { %v2030_v56 = vmul.f32 %v3245_v4, %v3731_v22  ;;  %v1343_v1 = vmul.f32 %v3756_v29, %v3698_v55  ;;  %v2097_v47 = vadd.f32 %v3284_v25, %v2061_v36  ;;  %v1652_v37 = vmul.f32 %v3158_v26, %v1618_v20  ;;  %v4384_v33 = vld [vmem:[#allocation7_spill] sm:$0xff] }
 0x138   : > { %v1964_v16 = vadd.f32 %v1932_v60, %v1866_v58  ;;  %v1357_v61 = vmul.f32 %v3756_v29, %v3700_v8  ;;  %v1132_v3 = vmul.f32 %v4383_v43, %v753_v28  ;;  %v1111_v23 = vmul.f32 %v4384_v33, %v732_v52  ;;  %v3779_v8 = vld [vmem:[%s4309_s4 + $0x2] ss:$0 sm:$0xff] }
 0x139   : > { %v1638_v55 = vmul.f32 %v3769_v39, %v1898_v21  ;;  %v1246_v42 = vmul.f32 %v3743_v31, %v3713_v38  ;;  %v1344_v58 = vmul.f32 %v3756_v29, %v1898_v21  ;;  %v1441_v60 = vmul.f32 %v3779_v8, %v1995_v13  ;;  %v1814_v51 = vld [vmem:[#allocation2 + $0x138] sm:$0xff]  ;;  %v628_v28 = vpop.f32.mrf.mxu0 }
 0x13a   : > { %v2062_v49 = vadd.f32 %v2030_v56, %v1964_v16  ;;  %v1358_v36 = vmul.f32 %v3756_v29, %v1618_v20  ;;  %1187 = vst.msk [vmem:[#allocation2 + $0x140] sm:$0xff] %vm1146_vm2, %v1132_v3  ;;  %v1750_v11 = vmul.f32 %v3190_v19, %v1716_v5  ;;  %v1767_v16 = vadd.f32 %v1735_v50, %v1669_v10  ;;  %v680_v21 = vpop.f32.mrf.mxu2  ;;  %v1800_v33 = vld [vmem:[#allocation2 + $0x90] sm:$0xff] }
 0x13b   : > { %v1375_v38 = vadd.f32 %v1343_v1, %v1245_v14  ;;  %v1455_v56 = vmul.f32 %v3779_v8, %v1715_v46  ;;  %1166 = vst.msk [vmem:[#allocation2 + $0x98] sm:$0xff] %vm1146_vm2, %v1111_v23  ;;  %v2129_v52 = vmax.f32 %v2097_v47, 0.0  ;;  %v1684_v43 = vadd.f32 %v1652_v37, %v1586_v62 }
 0x13c   : > { %v2098_v26 = vadd.f32 %v3284_v25, %v2062_v49  ;;  %v1389_v13 = vadd.f32 %v1357_v61, %v1259_v59  ;;  %v681_v20 = vadd.f32 %v3660_v6, %v680_v21  ;;  %v629_v3 = vadd.f32 %v3660_v6, %v628_v28  ;;  %v3796_v59 = vld [vmem:[%s4309_s4 + $0x4] ss:$0 sm:$0xff] }
 0x13d   : > { %v1670_v54 = vadd.f32 %v1638_v55, %v1572_v12  ;;  %v1736_v50 = vmul.f32 %v3190_v19, %v3731_v22  ;;  %v1849_v46 = vmul.f32 %v3204_v2, %v1814_v51  ;;  %v1376_v10 = vadd.f32 %v1344_v58, %v1246_v42  ;;  %v4385_v61 = vld [vmem:[#allocation9_spill] sm:$0xff]  ;;  %v4386_v42 = vld [vmem:[#allocation4_spill] sm:$0xff] }
 0x13e   : > { %v2130_v49 = vmax.f32 %v2098_v26, 0.0  ;;  %v1390_v1 = vadd.f32 %v1358_v36, %v1260_v27  ;;  %v754_v23 = vmax.f32 %v681_v20, 0.0  ;;  %v733_v44 = vmax.f32 %v629_v3, 0.0 }
 0x13f   : > { %v1835_v47 = vmul.f32 %v3204_v2, %v1800_v33  ;;  %v1541_v62 = vmul.f32 %v3796_v59, %v1800_v33  ;;  %v1782_v12 = vadd.f32 %v1750_v11, %v1684_v43  ;;  %v1442_v19 = vmul.f32 %v3779_v8, %v3731_v22 }
 0x140   : > { %v2158_v14 = vpack.c.bf16 %v2130_v49, %v2129_v52  ;;  %v1473_v37 = vadd.f32 %v1441_v60, %v1375_v38  ;;  %v1456_v27 = vmul.f32 %v3779_v8, %v1716_v5  ;;  %v1133_v55 = vmul.f32 %v4385_v61, %v754_v23 }
 0x141   : > { %v1112_v2 = vmul.f32 %v4386_v42, %v733_v44  ;;  %v1768_v26 = vadd.f32 %v1736_v50, %v1670_v54  ;;  %v1487_v58 = vadd.f32 %v1455_v56, %v1389_v13  ;;  %v3805_v36 = vld [vmem:[#allocation2 + $0x140] sm:$0xff]  ;;  %v1474_v52 = vadd.f32 %v1442_v19, %v1376_v10  ;;  %v3820_v44 = vld [vmem:[%s4309_s4 + $0x9] ss:$0 sm:$0xff]  ;;  %v630_v20 = vpop.f32.mrf.mxu0 }
 0x142   : > { %2587 = vmatmul.msk.bf16.gmra.mxu1 %vm1146_vm2, %v2158_v14  ;;  %v3807_v21 = vld [vmem:[#allocation2 + $0x139] sm:$0xff]  ;;  %v1488_v11 = vadd.f32 %v1456_v27, %v1390_v1  ;;  %v1555_v49 = vmul.f32 %v3796_v59, %v1814_v51  ;;  %v3813_v22 = vmul.f32 %v3743_v31, %v1814_v51  ;;  %1188 = vst.msk [vmem:[#allocation2 + $0x148] sm:$0xff] %vm1146_vm2, %v1133_v55  ;;  %v3824_v56 = vld [vmem:[#allocation2 + $0x91] sm:$0xff]  ;;  %v683_v13 = vpop.f32.mrf.mxu2 }
 0x143   : > { %v3809_v28 = vld [vmem:[#allocation2 + $0x13a] sm:$0xff]  ;;  %v1881_v5 = vadd.f32 %v1849_v46, %v3750_v40  ;;  %v1947_v54 = vmul.f32 %v3820_v44, %v3807_v21  ;;  %v1867_v38 = vadd.f32 %v1835_v47, %v1767_v16  ;;  %v3826_v43 = vld [vmem:[#allocation2 + $0x92] sm:$0xff]  ;;  %v1573_v51 = vadd.f32 %v1541_v62, %v1473_v37  ;;  %1167 = vst.msk [vmem:[#allocation2 + $0xa0] sm:$0xff] %vm1146_vm2, %v1112_v2  ;;  %v3832_v40 = vld [vmem:[%s4309_s4 + $0x8] ss:$0 sm:$0xff] }
 0x144   : > { %v1801_v60 = vld [vmem:[#allocation2 + $0x98] sm:$0xff]  ;;  %v1850_v3 = vmul.f32 %v3832_v40, %v3805_v36  ;;  %v2045_v16 = vmul.f32 %v3245_v4, %v3809_v28  ;;  %v1933_v50 = vmul.f32 %v3820_v44, %v3824_v56  ;;  %v1556_v14 = vmul.f32 %v3796_v59, %v3805_v36 }
 0x145   : > { %v684_v46 = vadd.f32 %v3660_v6, %v683_v13  ;;  %v631_v10 = vadd.f32 %v3660_v6, %v630_v20  ;;  %v1979_v1 = vadd.f32 %v1947_v54, %v1881_v5  ;;  %v1836_v23 = vmul.f32 %v3832_v40, %v1801_v60  ;;  %v4387_v54 = vld [vmem:[#allocation14_spill] sm:$0xff] }
 0x146   : > { %v1965_v47 = vadd.f32 %v1933_v50, %v1867_v38  ;;  %v2031_v62 = vmul.f32 %v3245_v4, %v3826_v43  ;;  %v1542_v19 = vmul.f32 %v3796_v59, %v1801_v60  ;;  %v1639_v37 = vmul.f32 %v3769_v39, %v3824_v56  ;;  %v4388_v50 = vld [vmem:[#allocation10_spill] sm:$0xff] }
 0x147   : > { %v755_v27 = vmax.f32 %v684_v46, 0.0  ;;  %v734_v61 = vmax.f32 %v631_v10, 0.0  ;;  %v2077_v55 = vadd.f32 %v2045_v16, %v1979_v1  ;;  %v1247_v42 = vmul.f32 %v3743_v31, %v1800_v33 }
 0x148   : > { %v2063_v2 = vadd.f32 %v2031_v62, %v1965_v47  ;;  %v1671_v13 = vadd.f32 %v1639_v37, %v1573_v51  ;;  %v1587_v20 = vadd.f32 %v1555_v49, %v1487_v58  ;;  %v1653_v5 = vmul.f32 %v3769_v39, %v3807_v21  ;;  %v3873_v47 = vld [vmem:[%s4310_s5] ss:$0 sm:$0xff] }
 0x149   : > { %v1134_v38 = vmul.f32 %v4387_v54, %v755_v27  ;;  %v1113_v4 = vmul.f32 %v4388_v50, %v734_v61  ;;  %v1882_v17 = vadd.f32 %v1850_v3, %v1782_v12  ;;  %v1737_v16 = vmul.f32 %v3858_v15, %v3826_v43  ;;  %v3862_v33 = vld [vmem:[#allocation2 + $0x141] sm:$0xff]  ;;  %v3886_v61 = vld [vmem:[%s4309_s4 + $0xa] ss:$0 sm:$0xff] }
 0x14a   : > { %v3864_v51 = vld [vmem:[#allocation2 + $0x142] sm:$0xff]  ;;  %v2113_v58 = vadd.f32 %v3284_v25, %v2077_v55  ;;  %v1868_v49 = vadd.f32 %v1836_v23, %v1768_v26  ;;  %v1574_v46 = vadd.f32 %v1542_v19, %v1474_v52  ;;  %v1588_v10 = vadd.f32 %v1556_v14, %v1488_v11  ;;  %v1900_v3 = vld [vmem:[#allocation2 + $0x99] sm:$0xff]  ;;  %v685_v26 = vpop.f32.mrf.mxu2 }
 0x14b   : > { %1189 = vst.msk [vmem:[#allocation2 + $0x150] sm:$0xff] %vm1146_vm2, %v1134_v38  ;;  %v1948_v12 = vmul.f32 %v3820_v44, %v3862_v33  ;;  %v1998_v1 = vld [vmem:[#allocation2 + $0x9a] sm:$0xff]  ;;  %v2099_v62 = vadd.f32 %v3873_v47, %v2063_v2  ;;  %v1769_v37 = vadd.f32 %v1737_v16, %v1671_v13  ;;  %v1751_v25 = vmul.f32 %v3858_v15, %v3809_v28 }
 0x14c   : > { %1168 = vst.msk [vmem:[#allocation2 + $0xa8] sm:$0xff] %vm1146_vm2, %v1113_v4  ;;  %v1934_v52 = vmul.f32 %v3820_v44, %v1900_v3  ;;  %v1640_v11 = vmul.f32 %v3769_v39, %v1900_v3  ;;  %v1685_v14 = vadd.f32 %v1653_v5, %v1587_v20  ;;  %v1248_v23 = vmul.f32 %v3743_v31, %v1801_v60 }
 0x14d   : > { %v686_v19 = vadd.f32 %v3660_v6, %v685_v26  ;;  %v1980_v27 = vadd.f32 %v1948_v12, %v1882_v17  ;;  %v2046_v55 = vmul.f32 %v3886_v61, %v3864_v51  ;;  %v1654_v2 = vmul.f32 %v3769_v39, %v3862_v33  ;;  %v4389_v26 = vld [vmem:[#allocation13_spill] sm:$0xff] }
 0x14e   : > { %v1966_v13 = vadd.f32 %v1934_v52, %v1868_v49  ;;  %v2032_v54 = vmul.f32 %v3886_v61, %v1998_v1  ;;  %v1672_v20 = vadd.f32 %v1640_v11, %v1574_v46  ;;  %v1738_v60 = vmul.f32 %v3858_v15, %v1998_v1 }
 0x14f   : > { %v756_v5 = vmax.f32 %v686_v19, 0.0  ;;  %v2078_v6 = vadd.f32 %v2046_v55, %v1980_v27  ;;  %v1345_v17 = vmul.f32 %v3756_v29, %v3824_v56  ;;  %v1346_v38 = vmul.f32 %v3756_v29, %v1900_v3 }
 0x150   : > { %v2145_v50 = vmax.f32 %v2113_v58, 0.0  ;;  %v2064_v4 = vadd.f32 %v2032_v54, %v1966_v13  ;;  %v2131_v16 = vmax.f32 %v2099_v62, 0.0  ;;  %v1770_v12 = vadd.f32 %v1738_v60, %v1672_v20 }
 0x151   : > { %v1135_v7 = vmul.f32 %v4389_v26, %v756_v5  ;;  %v2114_v49 = vadd.f32 %v3873_v47, %v2078_v6  ;;  %v1377_v52 = vadd.f32 %v1345_v17, %v1247_v42  ;;  %v1378_v63 = vadd.f32 %v1346_v38, %v1248_v23  ;;  %v4390_v17 = vld [vmem:[#allocation16_spill] sm:$0xff] }
 0x152   : > { %v2100_v46 = vadd.f32 %v3873_v47, %v2064_v4  ;;  %v1870_v11 = vadd.f32 %v3316_v48, %v1770_v12  ;;  %v1686_v19 = vadd.f32 %v1654_v2, %v1588_v10  ;;  %v3901_v27 = vld [vmem:[#allocation2 + $0x150] sm:$0xff]  ;;  %v1443_v56 = vmul.f32 %v3779_v8, %v3826_v43 }
 0x153   : > { %1190 = vst.msk [vmem:[#allocation2 + $0x158] sm:$0xff] %vm1146_vm2, %v1135_v7  ;;  %v2146_v58 = vmax.f32 %v2114_v49, 0.0  ;;  %v3906_v3 = vld [vmem:[#allocation2 + $0xa8] sm:$0xff]  ;;  %v1752_v42 = vmul.f32 %v3858_v15, %v3864_v51  ;;  %v1783_v23 = vadd.f32 %v1751_v25, %v1685_v14  ;;  %v1444_v55 = vmul.f32 %v3779_v8, %v1998_v1 }
 0x154   : > { %v3908_v62 = vld [vmem:[#allocation2 + $0xa9] sm:$0xff]  ;;  %v2132_v48 = vmax.f32 %v2100_v46, 0.0  ;;  %v1837_v10 = vmul.f32 %v3832_v40, %v3906_v3  ;;  %v1851_v43 = vmul.f32 %v3832_v40, %v3901_v27  ;;  %v1475_v2 = vadd.f32 %v1443_v56, %v1377_v52 }
 0x155   : > { %v2166_v7 = vpack.c.bf16 %v2146_v58, %v2145_v50  ;;  %v1968_v13 = vadd.f32 %v3325_v34, %v1870_v11  ;;  %v3918_v54 = vld [vmem:[#allocation2 + $0xaa] sm:$0xff]  ;;  %v1476_v20 = vadd.f32 %v1444_v55, %v1378_v63  ;;  %v1359_v60 = vmul.f32 %v3756_v29, %v3807_v21 }
 0x156   : > { %v2159_v25 = vpack.c.bf16 %v2132_v48, %v2131_v16  ;;  %v1869_v14 = vadd.f32 %v1837_v10, %v1769_v37  ;;  %v1935_v1 = vmul.f32 %v3820_v44, %v3908_v62  ;;  %v1543_v5 = vmul.f32 %v3796_v59, %v3906_v3  ;;  %v4391_v16 = vld [vmem:[#allocation15_spill] sm:$0xff] }
 0x157   : > { %2595 = vmatmul.msk.bf16.vlgmr.msrb.gmra.mxu3 %vm1146_vm2, %v2166_v7  ;;  %v1784_v6 = vadd.f32 %v1752_v42, %v1686_v19  ;;  %v1576_v38 = vadd.f32 %v4390_v17, %v1476_v20  ;;  %v1262_v34 = vmul.f32 %v3743_v31, %v3805_v36  ;;  %v1360_v63 = vmul.f32 %v3756_v29, %v3862_v33 }
 0x158   : > { %2588 = vmatmul.msk.bf16.gmra.mxu1 %vm1146_vm2, %v2159_v25  ;;  %v1967_v21 = vadd.f32 %v1935_v1, %v1869_v14  ;;  %v2033_v37 = vmul.f32 %v3886_v61, %v3918_v54  ;;  %v1575_v50 = vadd.f32 %v1543_v5, %v1475_v2  ;;  %v1641_v4 = vmul.f32 %v3769_v39, %v3908_v62 }
 0x159   : > { %v2066_v12 = vadd.f32 %v4391_v16, %v1968_v13  ;;  %v1883_v26 = vadd.f32 %v1851_v43, %v1783_v23  ;;  %v1674_v49 = vadd.f32 %v3367_v35, %v1576_v38  ;;  %v1739_v36 = vmul.f32 %v3858_v15, %v3918_v54 }
 0x15a   : > { %v2065_v52 = vadd.f32 %v2033_v37, %v1967_v21  ;;  %v1817_v33 = vld [vmem:[#allocation2 + $0x158] sm:$0xff]  ;;  %v1673_v19 = vadd.f32 %v1641_v4, %v1575_v50  ;;  %v1391_v56 = vadd.f32 %v1359_v60, %v3813_v22  ;;  %v1392_v58 = vadd.f32 %v1360_v63, %v1262_v34 }
 0x15b   : > { %v1915_v46 = vld [vmem:[#allocation2 + $0x151] sm:$0xff]  ;;  %v1916_v11 = vld [vmem:[#allocation2 + $0x159] sm:$0xff]  ;;  %v1852_v42 = vmul.f32 %v3832_v40, %v1817_v33  ;;  %v1772_v23 = vadd.f32 %v3375_v24, %v1674_v49  ;;  %v1457_v35 = vmul.f32 %v3779_v8, %v3809_v28  ;;  %v1458_v7 = vmul.f32 %v3779_v8, %v3864_v51 }
 0x15c   : > { %v1949_v55 = vmul.f32 %v3820_v44, %v1915_v46  ;;  %v2013_v48 = vld [vmem:[#allocation2 + $0x152] sm:$0xff]  ;;  %v1950_v10 = vmul.f32 %v3820_v44, %v1916_v11  ;;  %v2014_v43 = vld [vmem:[#allocation2 + $0x15a] sm:$0xff]  ;;  %v1771_v2 = vadd.f32 %v1739_v36, %v1673_v19  ;;  %v1557_v22 = vmul.f32 %v3796_v59, %v3901_v27 }
 0x15d   : > { %v2101_v13 = vadd.f32 %v3873_v47, %v2065_v52  ;;  %v1884_v20 = vadd.f32 %v1852_v42, %v1784_v6  ;;  %v2047_v25 = vmul.f32 %v3886_v61, %v2013_v48  ;;  %v2102_v24 = vadd.f32 %v3873_v47, %v2066_v12 }
 0x15e   : > { %v1981_v60 = vadd.f32 %v1949_v55, %v1883_v26  ;;  %v1489_v14 = vadd.f32 %v1457_v35, %v1391_v56  ;;  %v1490_v28 = vadd.f32 %v1458_v7, %v1392_v58  ;;  %v1558_v1 = vmul.f32 %v3796_v59, %v1817_v33 }
 0x15f   : > { %v1982_v5 = vadd.f32 %v1950_v10, %v1884_v20  ;;  %v2048_v17 = vmul.f32 %v3886_v61, %v2014_v43  ;;  %v1872_v51 = vadd.f32 %v3430_v41, %v1772_v23  ;;  %v1871_v34 = vadd.f32 %v3436_v32, %v1771_v2 }
 0x160   : > { %v2079_v38 = vadd.f32 %v2047_v25, %v1981_v60  ;;  %v1589_v63 = vadd.f32 %v1557_v22, %v1489_v14  ;;  %v1590_v21 = vadd.f32 %v1558_v1, %v1490_v28  ;;  %v1655_v6 = vmul.f32 %v3769_v39, %v1915_v46  ;;  %v4392_v60 = vld [vmem:[#allocation23_spill] sm:$0xff]  ;;  %v4393_v25 = vld [vmem:[#allocation22_spill] sm:$0xff]  ;;  %v4395_v14 = vld [vmem:[#allocation37_spill] sm:$0xff] }
 0x161   : > { %v2133_v37 = vmax.f32 %v2101_v13, 0.0  ;;  %v2080_v50 = vadd.f32 %v2048_v17, %v1982_v5  ;;  %v1656_v16 = vmul.f32 %v3769_v39, %v1916_v11  ;;  %v2134_v12 = vmax.f32 %v2102_v24, 0.0  ;;  %v4397_v17 = vld [vmem:[#allocation24_spill] sm:$0xff] }
 0x162   : > { %v2115_v4 = vadd.f32 %v3873_v47, %v2079_v38  ;;  %v1687_v26 = vadd.f32 %v1655_v6, %v1589_v63  ;;  %v1753_v49 = vmul.f32 %v3858_v15, %v2013_v48  ;;  %v1479_v36 = vadd.f32 %v3515_v57, %v3528_v53  ;;  %v4398_v38 = vld [vmem:[#allocation17_spill] sm:$0xff] }
 0x163   : > { %v2116_v41 = vadd.f32 %v3873_v47, %v2080_v50  ;;  %v1970_v32 = vadd.f32 %v3449_v0, %v1872_v51  ;;  %v1688_v52 = vadd.f32 %v1656_v16, %v1590_v21  ;;  %v1754_v19 = vmul.f32 %v3858_v15, %v2014_v43  ;;  %v4400_v6 = vld [vmem:[#allocation21_spill] sm:$0xff]  ;;  %v4401_v50 = vld [vmem:[#allocation19_spill] sm:$0xff] }
 0x164   : > { %v1969_v56 = vadd.f32 %v3443_v45, %v1871_v34  ;;  %v1785_v58 = vadd.f32 %v1753_v49, %v1687_v26  ;;  %v1249_v42 = vmul.f32 %v3743_v31, %v3906_v3  ;;  %v1347_v55 = vmul.f32 %v3756_v29, %v3908_v62  ;;  %v4399_v34 = vld [vmem:[#allocation5_spill] sm:$0xff] }
 0x165   : > { %v2160_v23 = vpack.c.bf16 %v2134_v12, %v2133_v37  ;;  %v2147_v35 = vmax.f32 %v2115_v4, 0.0  ;;  %v2148_v10 = vmax.f32 %v2116_v41, 0.0  ;;  %v1786_v57 = vadd.f32 %v1754_v19, %v1688_v52  ;;  %v4402_v16 = vld [vmem:[#allocation25_spill] sm:$0xff]  ;;  %v4404_v41 = vld [vmem:[#allocation40_spill] sm:$0xff] }
 0x166   : > { %v1885_v53 = vadd.f32 %v3611_v9, %v1785_v58  ;;  %v1379_v2 = vadd.f32 %v1347_v55, %v1249_v42  ;;  %v1445_v0 = vmul.f32 %v3779_v8, %v3918_v54  ;;  %v1263_v45 = vmul.f32 %v3743_v31, %v3901_v27  ;;  %v4394_v27 = vld [vmem:[#allocation39_spill] sm:$0xff]  ;;  %v4403_v26 = vld [vmem:[#allocation33_spill] sm:$0xff]  ;;  %v1821_v58 = vld [vmem:[#allocation2 + $0x188] sm:$0xff] }
 0x167   : > { %v2167_v7 = vpack.c.bf16 %v2148_v10, %v2147_v35  ;;  %v1886_v22 = vadd.f32 %v3601_v30, %v1786_v57  ;;  %v1264_v3 = vmul.f32 %v3743_v31, %v1817_v33  ;;  %v1361_v62 = vmul.f32 %v3756_v29, %v1915_v46  ;;  %v4396_v46 = vld [vmem:[#allocation18_spill] sm:$0xff]  ;;  %v4405_v52 = vld [vmem:[#allocation41_spill] sm:$0xff]  ;;  %v4406_v42 = vld [vmem:[#allocation31_spill] sm:$0xff] }
 0x168   : > { %2589 = vmatmul.msk.bf16.gmra.mxu1 %vm1146_vm2, %v2160_v23  ;;  %v2067_v13 = vadd.f32 %v3453_v18, %v1969_v56  ;;  %v1477_v20 = vadd.f32 %v1445_v0, %v1379_v2  ;;  %v1362_v9 = vmul.f32 %v3756_v29, %v1916_v11  ;;  %v1480_v54 = vadd.f32 %v4393_v25, %v4392_v60  ;;  %v1820_v56 = vld [vmem:[#allocation2 + $0x180] sm:$0xff]  ;;  %v4407_v23 = vld [vmem:[#allocation20_spill] sm:$0xff]  ;;  %v4408_v10 = vld [vmem:[#allocation42_spill] sm:$0xff] }
 0x169   : > { %2596 = vmatmul.msk.bf16.gmra.mxu3 %vm1146_vm2, %v2167_v7  ;;  %v1983_v24 = vadd.f32 %v4394_v27, %v1885_v53  ;;  %v1984_v30 = vadd.f32 %v4395_v14, %v1886_v22  ;;  %v1393_v28 = vadd.f32 %v1361_v62, %v1263_v45  ;;  %v1459_v33 = vmul.f32 %v3779_v8, %v2013_v48  ;;  %v4010_v53 = vld [vmem:[#allocation2 + $0x181] sm:$0xff]  ;;  %v4409_v2 = vld [vmem:[#allocation35_spill] sm:$0xff]  ;;  %v4410_v45 = vld [vmem:[#allocation32_spill] sm:$0xff] }
 0x16a   : > { %v1577_v1 = vadd.f32 %v4396_v46, %v1477_v20  ;;  %v1394_v5 = vadd.f32 %v1362_v9, %v1264_v3  ;;  %v1460_v18 = vmul.f32 %v3779_v8, %v2014_v43  ;;  %v1547_v11 = vmul.f32 %v3796_v59, %v4397_v17  ;;  %v4411_v62 = vld [vmem:[#allocation43_spill] sm:$0xff]  ;;  %v4412_v9 = vld [vmem:[#allocation44_spill] sm:$0xff] }
 0x16b   : > { %v2068_v51 = vadd.f32 %v4398_v38, %v1970_v32  ;;  %v2082_v63 = vadd.f32 %v4399_v34, %v1984_v30  ;;  %v1491_v21 = vadd.f32 %v1459_v33, %v1393_v28  ;;  %v1548_v37 = vmul.f32 %v3796_v59, %v4400_v6  ;;  %v4413_v28 = vld [vmem:[#allocation45_spill] sm:$0xff]  ;;  %v1920_v17 = vld [vmem:[#allocation2 + $0x189] sm:$0xff] }
 0x16c   : > { %v1675_v4 = vadd.f32 %v4401_v50, %v1577_v1  ;;  %v1492_v48 = vadd.f32 %v1460_v18, %v1394_v5  ;;  %v1645_v12 = vmul.f32 %v3769_v39, %v4402_v16  ;;  %v1265_v43 = vmul.f32 %v3743_v31, %v4403_v26  ;;  %v4415_v5 = vld [vmem:[#allocation47_spill] sm:$0xff]  ;;  %v4417_v50 = vld [vmem:[#allocation38_spill] sm:$0xff]  ;;  %v2248_v26 = vpop.f32.mrf.mxu1 }
 0x16d   : > { %v2103_v49 = vadd.f32 %v3873_v47, %v2067_v13  ;;  %v2081_v32 = vadd.f32 %v4404_v41, %v1983_v24  ;;  %v1591_v19 = vadd.f32 %v4405_v52, %v1491_v21  ;;  %v1266_v55 = vmul.f32 %v3743_v31, %v4406_v42  ;;  %v4416_v21 = vld [vmem:[#allocation36_spill] sm:$0xff]  ;;  %v4418_v42 = vld [vmem:[#allocation30_spill] sm:$0xff] }
 0x16e   : > { %v1773_v35 = vadd.f32 %v4407_v23, %v1675_v4  ;;  %v1592_v57 = vadd.f32 %v4408_v10, %v1492_v48  ;;  %v1363_v0 = vmul.f32 %v3756_v29, %v4409_v2  ;;  %v1364_v7 = vmul.f32 %v3756_v29, %v4410_v45  ;;  %v2017_v23 = vld [vmem:[#allocation2 + $0x182] sm:$0xff] }
 0x16f   : > { %v2104_v22 = vadd.f32 %v3873_v47, %v2068_v51  ;;  %v2118_v3 = vadd.f32 %v3873_v47, %v2082_v63  ;;  %v1689_v13 = vadd.f32 %v4411_v62, %v1591_v19  ;;  %v1579_v20 = vadd.f32 %v1547_v11, %v1479_v36  ;;  %v4037_v36 = vld [vmem:[%s4312_s7] ss:$0 sm:$0xff]  ;;  %v4065_v62 = vld [vmem:[#allocation2 + $0xf8] sm:$0xff] }
 0x170   : > { %v1690_v60 = vadd.f32 %v4412_v9, %v1592_v57  ;;  %v1855_v25 = vmul.f32 %v3832_v40, %v1820_v56  ;;  %v1856_v27 = vmul.f32 %v3832_v40, %v1821_v58  ;;  %v1580_v24 = vadd.f32 %v1548_v37, %v1480_v54  ;;  %v4414_v54 = vld [vmem:[#allocation29_spill] sm:$0xff] }
 0x171   : > { %v2135_v14 = vmax.f32 %v2103_v49, 0.0  ;;  %v2117_v30 = vadd.f32 %v3873_v47, %v2081_v32  ;;  %v1787_v33 = vadd.f32 %v4413_v28, %v1689_v13  ;;  %v1953_v46 = vmul.f32 %v3820_v44, %v4010_v53  ;;  %v2328_v49 = vld [vmem:[%s4032_s14] sm:$0xff] }
 0x172   : > { %v1873_v1 = vadd.f32 %v4414_v54, %v1773_v35  ;;  %v1788_v18 = vadd.f32 %v4415_v5, %v1690_v60  ;;  %v1395_v11 = vadd.f32 %v1363_v0, %v1265_v43  ;;  %v1396_v38 = vadd.f32 %v1364_v7, %v1266_v55  ;;  %v2018_v35 = vld [vmem:[#allocation2 + $0x18a] sm:$0xff]  ;;  %v1823_v5 = vld [vmem:[#allocation2 + $0x1a0] sm:$0xff] }
 0x173   : > { %v2136_v51 = vmax.f32 %v2104_v22, 0.0  ;;  %v2150_v34 = vmax.f32 %v2118_v3, 0.0  ;;  %v1887_v63 = vadd.f32 %v1855_v25, %v1787_v33  ;;  %v1461_v6 = vmul.f32 %v3779_v8, %v4416_v21  ;;  %v4419_v0 = vld [vmem:[#allocation26_spill] sm:$0xff]  ;;  %v4420_v7 = vld [vmem:[#allocation27_spill] sm:$0xff]  ;;  %v2662_v21 = vld [vmem:[#allocation2 + $0xd8] sm:$0xff] }
 0x174   : > { %v1888_v37 = vadd.f32 %v1856_v27, %v1788_v18  ;;  %v1462_v4 = vmul.f32 %v3779_v8, %v4417_v50  ;;  %v1561_v48 = vmul.f32 %v3796_v59, %v1820_v56  ;;  %v1562_v16 = vmul.f32 %v3796_v59, %v1821_v58  ;;  %v4063_v3 = vld [vmem:[#allocation2 + $0xf0] sm:$0xff]  ;;  %v4421_v27 = vld [vmem:[#allocation28_spill] sm:$0xff] }
 0x175   : > { %v2161_v41 = vpack.c.bf16 %v2136_v51, %v2135_v14  ;;  %v2149_v43 = vmax.f32 %v2117_v30, 0.0  ;;  %v1954_v32 = vmul.f32 %v3820_v44, %v1920_v17  ;;  %v1677_v52 = vadd.f32 %v1645_v12, %v1579_v20  ;;  %v4422_v30 = vld [vmem:[#allocation34_spill] sm:$0xff] }
 0x176   : > { %v2249_v19 = vadd.f32 %v4037_v36, %v2248_v26  ;;  %v1971_v55 = vadd.f32 %v4418_v42, %v1873_v1  ;;  %v1493_v10 = vadd.f32 %v1461_v6, %v1395_v11  ;;  %v1494_v57 = vadd.f32 %v1462_v4, %v1396_v38  ;;  %v1822_v1 = vld [vmem:[#allocation2 + $0x198] sm:$0xff] }
 0x177   : > { %v2168_v56 = vpack.c.bf16 %v2150_v34, %v2149_v43  ;;  %v1985_v58 = vadd.f32 %v1953_v46, %v1887_v63  ;;  %v1986_v2 = vadd.f32 %v1954_v32, %v1888_v37  ;;  %v1646_v12 = vmul.f32 %v3769_v39, %v4419_v0  ;;  %v2329_v37 = vld [vmem:[%s4032_s14 + $0x8] sm:$0xff]  ;;  %v4093_v43 = vld [vmem:[#allocation2 + $0xf9] sm:$0xff] }
 0x178   : > { %v2360_v45 = vadd.f32 %v2328_v49, %v2249_v19  ;;  %2590 = vmatmul.msk.bf16.gmra.mxu1 %vm1146_vm2, %v2161_v41  ;;  %v1743_v22 = vmul.f32 %v3858_v15, %v4420_v7  ;;  %v1593_v13 = vadd.f32 %v1561_v48, %v1493_v10  ;;  %v1594_v20 = vadd.f32 %v1562_v16, %v1494_v57  ;;  %v2663_v48 = vld [vmem:[#allocation2 + $0xd9] sm:$0xff]  ;;  %v4091_v41 = vld [vmem:[#allocation2 + $0xf1] sm:$0xff]  ;;  %v2665_v19 = vld [vmem:[#allocation2 + $0xe1] sm:$0xff] }
 0x179   : > { %2597 = vmatmul.msk.bf16.gmra.mxu3 %vm1146_vm2, %v2168_v56  ;;  %v2051_v9 = vmul.f32 %v3886_v61, %v2017_v23  ;;  %v2052_v60 = vmul.f32 %v3886_v61, %v2018_v35  ;;  %v1678_v25 = vadd.f32 %v1646_v12, %v1580_v24  ;;  %v1744_v14 = vmul.f32 %v3858_v15, %v4421_v27  ;;  %v2664_v32 = vld [vmem:[#allocation2 + $0xe0] sm:$0xff] }
 0x17a   : > { %2392 = vst.msk [vmem:[%s4056_s18] sm:$0xff] %vm483_vm1, %v2360_v45  ;;  %v2069_v28 = vadd.f32 %v4422_v30, %v1971_v55  ;;  %v1775_v33 = vadd.f32 %v1743_v22, %v1677_v52  ;;  %v1659_v46 = vmul.f32 %v3769_v39, %v4010_v53  ;;  %v1660_v54 = vmul.f32 %v3769_v39, %v1920_v17  ;;  %v2250_v53 = vpop.f32.mrf.mxu1  ;;  %v4423_v55 = vld [vmem:[#allocation46_spill] sm:$0xff]  ;;  %v1921_v22 = vld [vmem:[#allocation2 + $0x199] sm:$0xff] }
 0x17b   : > { %v2083_v18 = vadd.f32 %v2051_v9, %v1985_v58  ;;  %v2084_v11 = vadd.f32 %v2052_v60, %v1986_v2  ;;  %v1843_v24 = vmul.f32 %v3832_v40, %v4063_v3  ;;  %v1844_v38 = vmul.f32 %v3832_v40, %v4065_v62 }
 0x17c   : > { %v1691_v51 = vadd.f32 %v1659_v46, %v1593_v13  ;;  %v1692_v34 = vadd.f32 %v1660_v54, %v1594_v20  ;;  %v1757_v63 = vmul.f32 %v3858_v15, %v2017_v23  ;;  %v1253_v6 = vmul.f32 %v2662_v21, %v3743_v31  ;;  %v1922_v13 = vld [vmem:[#allocation2 + $0x1a1] sm:$0xff]  ;;  %v4109_v54 = vld [vmem:[#allocation2 + $0xf2] sm:$0xff] }
 0x17d   : > { %v1758_v17 = vmul.f32 %v3858_v15, %v2018_v35  ;;  %v1857_v50 = vmul.f32 %v3832_v40, %v1822_v1  ;;  %v1858_v4 = vmul.f32 %v3832_v40, %v1823_v5  ;;  %v1351_v16 = vmul.f32 %v2663_v48, %v3756_v29  ;;  %v4111_v1 = vld [vmem:[#allocation2 + $0xfa] sm:$0xff]  ;;  %v2020_v21 = vld [vmem:[#allocation2 + $0x1a2] sm:$0xff] }
 0x17e   : > { %v2251_v26 = vadd.f32 %v4037_v36, %v2250_v53  ;;  %v2105_v49 = vadd.f32 %v3873_v47, %v2069_v28  ;;  %v1254_v52 = vmul.f32 %v2664_v32, %v3743_v31  ;;  %v1352_v42 = vmul.f32 %v2665_v19, %v3756_v29  ;;  %v2666_v28 = vld [vmem:[#allocation2 + $0xda] sm:$0xff] }
 0x17f   : > { %v2138_v23 = vmax.f32 %v4423_v55, 0.0  ;;  %v2119_v35 = vadd.f32 %v3873_v47, %v2083_v18  ;;  %v2120_v10 = vadd.f32 %v3873_v47, %v2084_v11  ;;  %v1776_v57 = vadd.f32 %v1744_v14, %v1678_v25  ;;  %v2667_v11 = vld [vmem:[#allocation2 + $0xe2] sm:$0xff] }
 0x180   : > { %v2361_v56 = vadd.f32 %v2329_v37, %v2251_v26  ;;  %v1875_v58 = vadd.f32 %v1843_v24, %v1775_v33  ;;  %v1789_v2 = vadd.f32 %v1757_v63, %v1691_v51  ;;  %v1790_v0 = vadd.f32 %v1758_v17, %v1692_v34  ;;  %v2019_v63 = vld [vmem:[#allocation2 + $0x19a] sm:$0xff] }
 0x181   : > { %v1876_v12 = vadd.f32 %v1844_v38, %v1776_v57  ;;  %v1941_v45 = vmul.f32 %v3820_v44, %v4091_v41  ;;  %v1942_v7 = vmul.f32 %v3820_v44, %v4093_v43  ;;  %v1383_v20 = vadd.f32 %v1351_v16, %v1253_v6 }
 0x182   : > { %2393 = vst.msk [vmem:[%s4056_s18 + $0x8] sm:$0xff] %vm483_vm1, %v2361_v56  ;;  %v2137_v9 = vmax.f32 %v2105_v49, 0.0  ;;  %v1889_v60 = vadd.f32 %v1857_v50, %v1789_v2  ;;  %v1890_v27 = vadd.f32 %v1858_v4, %v1790_v0  ;;  %v1384_v25 = vadd.f32 %v1352_v42, %v1254_v52  ;;  %v2330_v0 = vld [vmem:[%s4032_s14 + $0x10] sm:$0xff] }
 0x183   : > { %v2151_v14 = vmax.f32 %v2119_v35, 0.0  ;;  %v2152_v30 = vmax.f32 %v2120_v10, 0.0  ;;  %v1449_v33 = vmul.f32 %v2666_v28, %v3779_v8  ;;  %v1549_v46 = vmul.f32 %v3796_v59, %v4063_v3  ;;  %v2253_v2 = vpop.f32.mrf.mxu1 }
 0x184   : > { %v1955_v5 = vmul.f32 %v3820_v44, %v1921_v22  ;;  %v1956_v18 = vmul.f32 %v3820_v44, %v1922_v13  ;;  %v1450_v24 = vmul.f32 %v2667_v11, %v3779_v8  ;;  %v1550_v38 = vmul.f32 %v3796_v59, %v4065_v62 }
 0x185   : > { %v1973_v51 = vadd.f32 %v1941_v45, %v1875_v58  ;;  %v1974_v34 = vadd.f32 %v1942_v7, %v1876_v12  ;;  %v1481_v6 = vadd.f32 %v1449_v33, %v1383_v20  ;;  %v2162_v53 = vpack.c.bf16 %v2138_v23, %v2137_v9  ;;  %v1811_v58 = vld [vmem:[#allocation2 + $0x110] sm:$0xff] }
 0x186   : > { %v1987_v37 = vadd.f32 %v1955_v5, %v1889_v60  ;;  %v1988_v17 = vadd.f32 %v1956_v18, %v1890_v27  ;;  %v1482_v50 = vadd.f32 %v1450_v24, %v1384_v25  ;;  %v2169_v4 = vpack.c.bf16 %v2152_v30, %v2151_v14  ;;  %v1810_v27 = vld [vmem:[#allocation2 + $0x108] sm:$0xff]  ;;  %v1910_v14 = vld [vmem:[#allocation2 + $0x111] sm:$0xff] }
 0x187   : > { %v2039_v48 = vmul.f32 %v3886_v61, %v4109_v54  ;;  %v2040_v16 = vmul.f32 %v3886_v61, %v4111_v1  ;;  %v1581_v26 = vadd.f32 %v1549_v46, %v1481_v6  ;;  %v2053_v49 = vmul.f32 %v3886_v61, %v2019_v63 }
 0x188   : > { %2591 = vmatmul.msk.bf16.gmra.mxu1 %vm1146_vm2, %v2162_v53  ;;  %v2054_v32 = vmul.f32 %v3886_v61, %v2020_v21  ;;  %v1582_v52 = vadd.f32 %v1550_v38, %v1482_v50  ;;  %v1647_v55 = vmul.f32 %v3769_v39, %v4091_v41  ;;  %v1648_v10 = vmul.f32 %v3769_v39, %v4093_v43  ;;  %v2008_v21 = vld [vmem:[#allocation2 + $0x112] sm:$0xff] }
 0x189   : > { %2598 = vmatmul.msk.bf16.gmra.mxu3 %vm1146_vm2, %v2169_v4  ;;  %v2071_v19 = vadd.f32 %v2039_v48, %v1973_v51  ;;  %v2072_v42 = vadd.f32 %v2040_v16, %v1974_v34  ;;  %v2085_v23 = vadd.f32 %v2053_v49, %v1987_v37  ;;  %v1745_v7 = vmul.f32 %v3858_v15, %v4109_v54  ;;  %v1909_v51 = vld [vmem:[#allocation2 + $0x109] sm:$0xff]  ;;  %v2331_v37 = vld [vmem:[%s4032_s14 + $0x18] sm:$0xff] }
 0x18a   : > { %v2086_v35 = vadd.f32 %v2054_v32, %v1988_v17  ;;  %v1679_v57 = vadd.f32 %v1647_v55, %v1581_v26  ;;  %v1680_v56 = vadd.f32 %v1648_v10, %v1582_v52  ;;  %v2254_v22 = vadd.f32 %v4037_v36, %v2253_v2  ;;  %v2007_v26 = vld [vmem:[#allocation2 + $0x10a] sm:$0xff] }
 0x18b   : > { %v2107_v12 = vadd.f32 %v3873_v47, %v2071_v19  ;;  %v2108_v45 = vadd.f32 %v3873_v47, %v2072_v42  ;;  %v2121_v13 = vadd.f32 %v3873_v47, %v2085_v23  ;;  %v1746_v9 = vmul.f32 %v3858_v15, %v4111_v1  ;;  %v2255_v53 = vpop.f32.mrf.mxu1 }
 0x18c   : > { %v2122_v20 = vadd.f32 %v3873_v47, %v2086_v35  ;;  %v1777_v60 = vadd.f32 %v1745_v7, %v1679_v57  ;;  %v1846_v25 = vmul.f32 %v3832_v40, %v1811_v58  ;;  %v1255_v30 = vmul.f32 %v3743_v31, %v4063_v3 }
 0x18d   : > { %v1256_v28 = vmul.f32 %v3743_v31, %v4065_v62  ;;  %v2362_v33 = vadd.f32 %v2330_v0, %v2254_v22  ;;  %v1778_v46 = vadd.f32 %v1746_v9, %v1680_v56  ;;  %v1353_v5 = vmul.f32 %v3756_v29, %v4091_v41  ;;  %v1911_v9 = vld [vmem:[#allocation2 + $0x121] sm:$0xff] }
 0x18e   : > { %v1354_v18 = vmul.f32 %v3756_v29, %v4093_v43  ;;  %v2139_v11 = vmax.f32 %v2107_v12, 0.0  ;;  %v2140_v24 = vmax.f32 %v2108_v45, 0.0  ;;  %v1845_v38 = vmul.f32 %v3832_v40, %v1810_v27  ;;  %v1812_v12 = vld [vmem:[#allocation2 + $0x120] sm:$0xff]  ;;  %v1912_v45 = vld [vmem:[#allocation2 + $0x129] sm:$0xff] }
 0x18f   : > { %2394 = vst.msk [vmem:[%s4056_s18 + $0x10] sm:$0xff] %vm483_vm1, %v2362_v33  ;;  %v1944_v3 = vmul.f32 %v3820_v44, %v1910_v14  ;;  %v2153_v34 = vmax.f32 %v2121_v13, 0.0  ;;  %v2154_v31 = vmax.f32 %v2122_v20, 0.0  ;;  %v1878_v63 = vadd.f32 %v1846_v25, %v1778_v46 }
 0x190   : > { %v1877_v62 = vadd.f32 %v1845_v38, %v1777_v60  ;;  %v1385_v6 = vadd.f32 %v1353_v5, %v1255_v30  ;;  %v1386_v41 = vadd.f32 %v1354_v18, %v1256_v28  ;;  %v2163_v17 = vpack.c.bf16 %v2140_v24, %v2139_v11  ;;  %v2332_v5 = vld [vmem:[%s4032_s14 + $0x20] sm:$0xff]  ;;  %v2010_v18 = vld [vmem:[#allocation2 + $0x12a] sm:$0xff] }
 0x191   : > { %v1943_v29 = vmul.f32 %v3820_v44, %v1909_v51  ;;  %v2256_v43 = vadd.f32 %v4037_v36, %v2255_v53  ;;  %v1976_v50 = vadd.f32 %v1944_v3, %v1878_v63  ;;  %v1451_v4 = vmul.f32 %v3779_v8, %v4109_v54 }
 0x192   : > { %v1452_v48 = vmul.f32 %v3779_v8, %v4111_v1  ;;  %v2170_v16 = vpack.c.bf16 %v2154_v31, %v2153_v34  ;;  %v2042_v49 = vmul.f32 %v3886_v61, %v2008_v21  ;;  %v1552_v32 = vmul.f32 %v3796_v59, %v1811_v58  ;;  %v1813_v58 = vld [vmem:[#allocation2 + $0x128] sm:$0xff] }
 0x193   : > { %v2363_v52 = vadd.f32 %v2331_v37, %v2256_v43  ;;  %v1975_v19 = vadd.f32 %v1943_v29, %v1877_v62  ;;  %v1483_v42 = vadd.f32 %v1451_v4, %v1385_v6  ;;  %v2041_v54 = vmul.f32 %v3886_v61, %v2007_v26 }
 0x194   : > { %v1484_v55 = vadd.f32 %v1452_v48, %v1386_v41  ;;  %v2074_v23 = vadd.f32 %v2042_v49, %v1976_v50  ;;  %v1551_v8 = vmul.f32 %v3796_v59, %v1810_v27  ;;  %v1650_v1 = vmul.f32 %v3769_v39, %v1910_v14  ;;  %v2334_v50 = vld [vmem:[%s4032_s14 + $0x30] sm:$0xff] }
 0x195   : > { %2395 = vst.msk [vmem:[%s4056_s18 + $0x18] sm:$0xff] %vm483_vm1, %v2363_v52  ;;  %v2073_v35 = vadd.f32 %v2041_v54, %v1975_v19  ;;  %v1649_v56 = vmul.f32 %v3769_v39, %v1909_v51  ;;  %v1748_v13 = vmul.f32 %v3858_v15, %v2008_v21  ;;  %v1848_v59 = vmul.f32 %v3832_v40, %v1813_v58  ;;  %v2009_v51 = vld [vmem:[#allocation2 + $0x122] sm:$0xff]  ;;  %v2350_v54 = vld [vmem:[%s4032_s14 + $0xb0] sm:$0xff]  ;;  %v2351_v58 = vld [vmem:[%s4032_s14 + $0xb8] sm:$0xff] }
 0x196   : > { %v1583_v10 = vadd.f32 %v1551_v8, %v1483_v42  ;;  %v1584_v57 = vadd.f32 %v1552_v32, %v1484_v55  ;;  %v2110_v2 = vadd.f32 %v3873_v47, %v2074_v23  ;;  %v1747_v20 = vmul.f32 %v3858_v15, %v2007_v26  ;;  %v2333_v21 = vld [vmem:[%s4032_s14 + $0x28] sm:$0xff]  ;;  %v2336_v52 = vld [vmem:[%s4032_s14 + $0x40] sm:$0xff] }
 0x197   : > { %v2109_v7 = vadd.f32 %v3873_v47, %v2073_v35  ;;  %v1847_v39 = vmul.f32 %v3832_v40, %v1812_v12  ;;  %v1946_v25 = vmul.f32 %v3820_v44, %v1912_v45  ;;  %v1945_v33 = vmul.f32 %v3820_v44, %v1911_v9  ;;  %v2337_v35 = vld [vmem:[%s4032_s14 + $0x48] sm:$0xff]  ;;  %v2338_v45 = vld [vmem:[%s4032_s14 + $0x50] sm:$0xff] }
 0x198   : > { %2592 = vmatmul.msk.bf16.gmra.mxu1 %vm1146_vm2, %v2163_v17  ;;  %v1682_v0 = vadd.f32 %v1650_v1, %v1584_v57  ;;  %v1681_v22 = vadd.f32 %v1649_v56, %v1583_v10  ;;  %v2142_v60 = vmax.f32 %v2110_v2, 0.0  ;;  %v2044_v34 = vmul.f32 %v3886_v61, %v2010_v18 }
 0x199   : > { %2599 = vmatmul.msk.bf16.gmra.mxu3 %vm1146_vm2, %v2170_v16  ;;  %v2141_v14 = vmax.f32 %v2109_v7, 0.0  ;;  %v2043_v44 = vmul.f32 %v3886_v61, %v2009_v51 }
 0x19a   : > { %v1780_v27 = vadd.f32 %v1748_v13, %v1682_v0  ;;  %v1779_v30 = vadd.f32 %v1747_v20, %v1681_v22 }
 0x19b   : > { %v2164_v15 = vpack.c.bf16 %v2142_v60, %v2141_v14  ;;  %v2339_v60 = vld [vmem:[%s4032_s14 + $0x58] sm:$0xff] }
 0x19c   : > { %v1880_v28 = vadd.f32 %v1848_v59, %v1780_v27  ;;  %v1879_v24 = vadd.f32 %v1847_v39, %v1779_v30  ;;  %v2352_v59 = vld [vmem:[%s4032_s14 + $0xc0] sm:$0xff]  ;;  %v2353_v30 = vld [vmem:[%s4032_s14 + $0xc8] sm:$0xff] }
 0x19e   : > { %v1978_v38 = vadd.f32 %v1946_v25, %v1880_v28  ;;  %v1977_v3 = vadd.f32 %v1945_v33, %v1879_v24  ;;  %v2354_v24 = vld [vmem:[%s4032_s14 + $0xd0] sm:$0xff] }
 0x1a0   : > { %v2076_v31 = vadd.f32 %v2044_v34, %v1978_v38  ;;  %v2075_v62 = vadd.f32 %v2043_v44, %v1977_v3 }
 0x1a2   : > { %v2112_v41 = vadd.f32 %v3873_v47, %v2076_v31  ;;  %v2111_v37 = vadd.f32 %v3873_v47, %v2075_v62  ;;  %v2335_v47 = vld [vmem:[%s4032_s14 + $0x38] sm:$0xff] }
 0x1a3   : > { %v2258_v46 = vpop.f32.mrf.mxu1  ;;  %v2355_v62 = vld [vmem:[%s4032_s14 + $0xd8] sm:$0xff] }
 0x1a4   : > { %v2259_v11 = vadd.f32 %v4037_v36, %v2258_v46  ;;  %v2144_v17 = vmax.f32 %v2112_v41, 0.0  ;;  %v2143_v29 = vmax.f32 %v2111_v37, 0.0  ;;  %v2340_v46 = vld [vmem:[%s4032_s14 + $0x60] sm:$0xff] }
 0x1a6   : > { %v2364_v40 = vadd.f32 %v2332_v5, %v2259_v11  ;;  %v2165_v61 = vpack.c.bf16 %v2144_v17, %v2143_v29  ;;  %v2356_v29 = vld [vmem:[%s4032_s14 + $0xe0] sm:$0xff] }
 0x1a8   : > { %2593 = vmatmul.msk.bf16.gmra.mxu1 %vm1146_vm2, %v2164_v15  ;;  %2396 = vst.msk [vmem:[%s4056_s18 + $0x20] sm:$0xff] %vm483_vm1, %v2364_v40  ;;  %v2341_v40 = vld [vmem:[%s4032_s14 + $0x68] sm:$0xff] }
 0x1ab   : > { %v2260_v63 = vpop.f32.mrf.mxu1 }
 0x1ac   : > { %v2261_v6 = vadd.f32 %v4037_v36, %v2260_v63 }
 0x1ae   : > { %v2365_v53 = vadd.f32 %v2333_v21, %v2261_v6  ;;  %v2342_v6 = vld [vmem:[%s4032_s14 + $0x70] sm:$0xff] }
 0x1b0   : > { %2397 = vst.msk [vmem:[%s4056_s18 + $0x28] sm:$0xff] %vm483_vm1, %v2365_v53 }
 0x1b8   : > { %2594 = vmatmul.msk.bf16.gmra.mxu1 %vm1146_vm2, %v2165_v61 }
 0x1bf   : > { %v2263_v43 = vpop.f32.mrf.mxu1 }
 0x1c0   : > { %v2264_v4 = vadd.f32 %v4037_v36, %v2263_v43 }
 0x1c2   : > { %v2366_v48 = vadd.f32 %v2334_v50, %v2264_v4  ;;  %v2343_v50 = vld [vmem:[%s4032_s14 + $0x78] sm:$0xff] }
 0x1c4   : > { %2398 = vst.msk [vmem:[%s4056_s18 + $0x30] sm:$0xff] %vm483_vm1, %v2366_v48 }
 0x1c7   : > { %v2265_v16 = vpop.f32.mrf.mxu1 }
 0x1c8   : > { %v2266_v26 = vadd.f32 %v4037_v36, %v2265_v16 }
 0x1ca   : > { %v2367_v49 = vadd.f32 %v2335_v47, %v2266_v26  ;;  %v2357_v26 = vld [vmem:[%s4032_s14 + $0xe8] sm:$0xff] }
 0x1cc   : > { %2399 = vst.msk [vmem:[%s4056_s18 + $0x38] sm:$0xff] %vm483_vm1, %v2367_v49 }
 0x1d5   : > { %v2268_v32 = vpop.f32.mrf.mxu1 }
 0x1d6   : > { %v2269_v19 = vadd.f32 %v4037_v36, %v2268_v32 }
 0x1d8   : > { %v2368_v42 = vadd.f32 %v2336_v52, %v2269_v19  ;;  %v2344_v52 = vld [vmem:[%s4032_s14 + $0x80] sm:$0xff] }
 0x1da   : > { %2400 = vst.msk [vmem:[%s4056_s18 + $0x40] sm:$0xff] %vm483_vm1, %v2368_v42  ;;  %v2303_v55 = vpop.f32.mrf.mxu3 }
 0x1db   : > { %v2304_v23 = vadd.f32 %v4037_v36, %v2303_v55 }
 0x1dd   : > { %v2382_v8 = vadd.f32 %v2350_v54, %v2304_v23  ;;  %v2270_v1 = vpop.f32.mrf.mxu1  ;;  %v2358_v23 = vld [vmem:[%s4032_s14 + $0xf0] sm:$0xff] }
 0x1de   : > { %v2271_v10 = vadd.f32 %v4037_v36, %v2270_v1 }
 0x1df   : > { %2414 = vst.msk [vmem:[%s4056_s18 + $0xb0] sm:$0xff] %vm483_vm1, %v2382_v8 }
 0x1e0   : > { %v2369_v57 = vadd.f32 %v2337_v35, %v2271_v10  ;;  %v2345_v35 = vld [vmem:[%s4032_s14 + $0x88] sm:$0xff] }
 0x1e2   : > { %2401 = vst.msk [vmem:[%s4056_s18 + $0x48] sm:$0xff] %vm483_vm1, %v2369_v57  ;;  %v2305_v56 = vpop.f32.mrf.mxu3 }
 0x1e3   : > { %v2306_v2 = vadd.f32 %v4037_v36, %v2305_v56 }
 0x1e5   : > { %v2383_v0 = vadd.f32 %v2351_v58, %v2306_v2  ;;  %v2273_v12 = vpop.f32.mrf.mxu1  ;;  %v2359_v2 = vld [vmem:[%s4032_s14 + $0xf8] sm:$0xff] }
 0x1e6   : > { %v2274_v7 = vadd.f32 %v4037_v36, %v2273_v12 }
 0x1e7   : > { %2415 = vst.msk [vmem:[%s4056_s18 + $0xb8] sm:$0xff] %vm483_vm1, %v2383_v0 }
 0x1e8   : > { %v2370_v22 = vadd.f32 %v2338_v45, %v2274_v7  ;;  %v2346_v45 = vld [vmem:[%s4032_s14 + $0x90] sm:$0xff] }
 0x1ea   : > { %2402 = vst.msk [vmem:[%s4056_s18 + $0x50] sm:$0xff] %vm483_vm1, %v2370_v22 }
 0x1ec   : > { %v2308_v13 = vpop.f32.mrf.mxu3 }
 0x1ed   : > { %v2309_v20 = vadd.f32 %v4037_v36, %v2308_v13  ;;  %v2275_v9 = vpop.f32.mrf.mxu1 }
 0x1ee   : > { %v2276_v27 = vadd.f32 %v4037_v36, %v2275_v9 }
 0x1ef   : > { %v2384_v39 = vadd.f32 %v2352_v59, %v2309_v20  ;;  %v2347_v20 = vld [vmem:[%s4032_s14 + $0x98] sm:$0xff] }
 0x1f0   : > { %v2371_v25 = vadd.f32 %v2339_v60, %v2276_v27 }
 0x1f1   : > { %2416 = vst.msk [vmem:[%s4056_s18 + $0xc0] sm:$0xff] %vm483_vm1, %v2384_v39  ;;  %v2348_v39 = vld [vmem:[%s4032_s14 + $0xa0] sm:$0xff] }
 0x1f2   : > { %2403 = vst.msk [vmem:[%s4056_s18 + $0x58] sm:$0xff] %vm483_vm1, %v2371_v25 }
 0x1f4   : > { %v2310_v14 = vpop.f32.mrf.mxu3 }
 0x1f5   : > { %v2311_v28 = vadd.f32 %v4037_v36, %v2310_v14  ;;  %v2278_v33 = vpop.f32.mrf.mxu1 }
 0x1f6   : > { %v2279_v5 = vadd.f32 %v4037_v36, %v2278_v33 }
 0x1f7   : > { %v2385_v18 = vadd.f32 %v2353_v30, %v2311_v28  ;;  %v2349_v28 = vld [vmem:[%s4032_s14 + $0xa8] sm:$0xff] }
 0x1f8   : > { %v2372_v11 = vadd.f32 %v2340_v46, %v2279_v5 }
 0x1f9   : > { %2417 = vst.msk [vmem:[%s4056_s18 + $0xc8] sm:$0xff] %vm483_vm1, %v2385_v18 }
 0x1fa   : > { %2404 = vst.msk [vmem:[%s4056_s18 + $0x60] sm:$0xff] %vm483_vm1, %v2372_v11 }
 0x1fc   : > { %v2313_v15 = vpop.f32.mrf.mxu3 }
 0x1fd   : > { %v2314_v38 = vadd.f32 %v4037_v36, %v2313_v15  ;;  %v2280_v51 = vpop.f32.mrf.mxu1 }
 0x1fe   : > { %v2281_v3 = vadd.f32 %v4037_v36, %v2280_v51 }
 0x1ff   : > { %v2386_v34 = vadd.f32 %v2354_v24, %v2314_v38 }
 0x200   : > { %v2373_v44 = vadd.f32 %v2341_v40, %v2281_v3 }
 0x201   : > { %2418 = vst.msk [vmem:[%s4056_s18 + $0xd0] sm:$0xff] %vm483_vm1, %v2386_v34 }
 0x202   : > { %2405 = vst.msk [vmem:[%s4056_s18 + $0x68] sm:$0xff] %vm483_vm1, %v2373_v44 }
 0x204   : > { %v2315_v31 = vpop.f32.mrf.mxu3 }
 0x205   : > { %v2316_v63 = vadd.f32 %v4037_v36, %v2315_v31  ;;  %v2283_v21 = vpop.f32.mrf.mxu1 }
 0x206   : > { %v2284_v41 = vadd.f32 %v4037_v36, %v2283_v21 }
 0x207   : > { %v2387_v53 = vadd.f32 %v2355_v62, %v2316_v63 }
 0x208   : > { %v2374_v37 = vadd.f32 %v2342_v6, %v2284_v41 }
 0x209   : > { %2419 = vst.msk [vmem:[%s4056_s18 + $0xd8] sm:$0xff] %vm483_vm1, %v2387_v53 }
 0x20a   : > { %2406 = vst.msk [vmem:[%s4056_s18 + $0x70] sm:$0xff] %vm483_vm1, %v2374_v37 }
 0x20c   : > { %v2318_v17 = vpop.f32.mrf.mxu3 }
 0x20d   : > { %v2319_v61 = vadd.f32 %v4037_v36, %v2318_v17  ;;  %v2285_v43 = vpop.f32.mrf.mxu1 }
 0x20e   : > { %v2286_v4 = vadd.f32 %v4037_v36, %v2285_v43 }
 0x20f   : > { %v2388_v48 = vadd.f32 %v2356_v29, %v2319_v61 }
 0x210   : > { %v2375_v16 = vadd.f32 %v2343_v50, %v2286_v4 }
 0x211   : > { %2420 = vst.msk [vmem:[%s4056_s18 + $0xe0] sm:$0xff] %vm483_vm1, %v2388_v48 }
 0x212   : > { %2407 = vst.msk [vmem:[%s4056_s18 + $0x78] sm:$0xff] %vm483_vm1, %v2375_v16 }
 0x214   : > { %v2320_v47 = vpop.f32.mrf.mxu3 }
 0x215   : > { %v2321_v49 = vadd.f32 %v4037_v36, %v2320_v47  ;;  %v2288_v32 = vpop.f32.mrf.mxu1 }
 0x216   : > { %v2289_v19 = vadd.f32 %v4037_v36, %v2288_v32 }
 0x217   : > { %v2389_v42 = vadd.f32 %v2357_v26, %v2321_v49 }
 0x218   : > { %v2376_v55 = vadd.f32 %v2344_v52, %v2289_v19 }
 0x219   : > { %2421 = vst.msk [vmem:[%s4056_s18 + $0xe8] sm:$0xff] %vm483_vm1, %v2389_v42 }
 0x21a   : > { %2408 = vst.msk [vmem:[%s4056_s18 + $0x80] sm:$0xff] %vm483_vm1, %v2376_v55 }
 0x21c   : > { %v2323_v54 = vpop.f32.mrf.mxu3 }
 0x21d   : > { %v2324_v8 = vadd.f32 %v4037_v36, %v2323_v54  ;;  %v2290_v1 = vpop.f32.mrf.mxu1 }
 0x21e   : > { %v2291_v10 = vadd.f32 %v4037_v36, %v2290_v1 }
 0x21f   : > { %v2390_v57 = vadd.f32 %v2358_v23, %v2324_v8 }
 0x220   : > { %v2377_v56 = vadd.f32 %v2345_v35, %v2291_v10 }
 0x221   : > { %2422 = vst.msk [vmem:[%s4056_s18 + $0xf0] sm:$0xff] %vm483_vm1, %v2390_v57 }
 0x222   : > { %2409 = vst.msk [vmem:[%s4056_s18 + $0x88] sm:$0xff] %vm483_vm1, %v2377_v56 }
 0x224   : > { %v2325_v58 = vpop.f32.mrf.mxu3 }
 0x225   : > { %v2326_v0 = vadd.f32 %v4037_v36, %v2325_v58  ;;  %v2293_v12 = vpop.f32.mrf.mxu1 }
 0x226   : > { %v2294_v7 = vadd.f32 %v4037_v36, %v2293_v12 }
 0x227   : > { %v2391_v22 = vadd.f32 %v2359_v2, %v2326_v0 }
 0x228   : > { %v2378_v13 = vadd.f32 %v2346_v45, %v2294_v7 }
 0x229   : > { %2423 = vst.msk [vmem:[%s4056_s18 + $0xf8] sm:$0xff] %vm483_vm1, %v2391_v22 }
 0x22a   : > { %2410 = vst.msk [vmem:[%s4056_s18 + $0x90] sm:$0xff] %vm483_vm1, %v2378_v13 }
 0x22d   : > { %v2295_v59 = vpop.f32.mrf.mxu1 }
 0x22e   : > { %v2296_v9 = vadd.f32 %v4037_v36, %v2295_v59 }
 0x230   : > { %v2379_v60 = vadd.f32 %v2347_v20, %v2296_v9 }
 0x232   : > { %2411 = vst.msk [vmem:[%s4056_s18 + $0x98] sm:$0xff] %vm483_vm1, %v2379_v60 }
 0x235   : > { %v2298_v27 = vpop.f32.mrf.mxu1 }
 0x236   : > { %v2299_v25 = vadd.f32 %v4037_v36, %v2298_v27 }
 0x238   : > { %v2380_v14 = vadd.f32 %v2348_v39, %v2299_v25 }
 0x23a   : > { %2412 = vst.msk [vmem:[%s4056_s18 + $0xa0] sm:$0xff] %vm483_vm1, %v2380_v14 }
 0x23d   : > { %v2300_v30 = vpop.f32.mrf.mxu1 }
 0x23e   : > { %v2301_v33 = vadd.f32 %v4037_v36, %v2300_v30 }
 0x240   : > { %v2381_v46 = vadd.f32 %v2349_v28, %v2301_v33 }
 0x242   : > { %2413 = vst.msk [vmem:[%s4056_s18 + $0xa8] sm:$0xff] %vm483_vm1, %v2381_v46 }
 0x243 PF: > { %s19_s11 = sadd.s32 1, %s2690_s11   ;;  %s4424_s30 = smov %s2686_s10 }
 0x244   : > { %p16_p5 = scmp.ge.s32.totalorder %s19_s11, 4   ;;  %s4425_s10 = smov %s4427_s12 }
 0x246   :  { %18 = sbr.rel (!%p16_p5) target bundleno = 2 (0x2), region = 95 }

</bundles_post_ra>
